<compile_context>
chip_gen: v6e
topology: v6e:2x2x1
jax: 0.10.0
libtpu: 0.0.40
codegen_flags: <defaults>
</compile_context>

<pallas_src>
import numpy as np
import jax
import jax.numpy as jnp
from jax import lax
from jax.experimental import pallas as pl
from jax.experimental.pallas import tpu as pltpu

_INV_SQRT2 = 0.7071067811865476

# ---- static geometry for 16x16 RGB inputs ---------------------------------------- #
H = W = 16
C_IN = 3
HO = WO = 8            # spatial size after conv1 (stride 2) == after conv2 (pad 1)
C1 = 64
C2 = 128
K1 = 7 * 7 * C_IN      # conv1 im2col contraction depth (147)
K1P = 256              # lane-padded conv1 contraction depth (two full vregs)
GW = 16                # flattened-grid column stride (power of two)
S1 = (HO + 2) * GW     # 160 rows/image: conv1 output on the zero-padded conv2 grid
Q2 = 120               # conv2 output rows/image (covers q = 16*oh + ow <= 119)


# ------------------------------ Pallas kernel -------------------------------------- #

def _make_plain_cnn_kernel(b_tile):
    def kernel(xcol_ref, b1g_ref, w1_ref, w2_ref, b2_ref, pool_ref, wfc_ref,
               bfc_ref, out_ref, y1_ref, acc_ref):
        # ---- conv1: ONE fused (B*160, 256) @ (256, 64) bf16 MXU pass ----
        x2d = xcol_ref[...].reshape(b_tile * S1, K1P)
        y = jnp.dot(x2d, w1_ref[...], preferred_element_type=jnp.float32)
        y = y.reshape(b_tile, S1, C1) + b1g_ref[...]       # bias pre-masked to valid rows
        # exact erf GELU (torch nn.GELU parity), f32 elementwise; zero pad rows stay 0.
        y = 0.5 * y * (1.0 + lax.erf(y * _INV_SQRT2))
        y1_ref[...] = y.astype(jnp.bfloat16)               # bf16 operand for conv2 MXU

        # ---- conv2 (3x3, pad 1): 9 shifted (B*120, 64) @ (64, 128) passes, f32 accum ----
        for t in range(9):
            dh, dw = divmod(t, 3)
            off = GW * dh + dw                             # static offset, 0..34
            a = y1_ref[:, off:off + Q2, :].reshape(b_tile * Q2, C1)
            contrib = jnp.dot(a, w2_ref[t], preferred_element_type=jnp.float32)
            if t == 0:
                acc_ref[...] = contrib
            else:
                acc_ref[...] += contrib

        # ---- AdaptiveAvgPool2d((2,2)) as one block-diagonal matmul, conv2 bias folded ----
        pooled = jnp.dot(pool_ref[...], acc_ref[...],
                         preferred_element_type=jnp.float32) + b2_ref[...]   # (4B, 128)

        # ---- Linear(512 -> 2): 4 accumulated (B, 128) @ (128, 2) passes ----
        logits = jnp.zeros((b_tile, 2), jnp.float32)
        for k in range(4):
            logits = logits + jnp.dot(pooled[k * b_tile:(k + 1) * b_tile, :],
                                      wfc_ref[k], preferred_element_type=jnp.float32)
        out_ref[...] = logits + bfc_ref[...]
    return kernel


# ------------------------------- glue (JAX / numpy) -------------------------------- #

def _valid_row_mask():
    # row p = 16*r + c of the padded grid holds conv1 output (r-1, c-1) iff valid.
    m = np.zeros((S1, 1), np.float32)
    for p in range(S1):
        r, c = divmod(p, GW)
        if 1 <= r <= HO and 1 <= c <= WO:
            m[p, 0] = 1.0
    return m


def _pool_matrix(b_tile):
    # block-diagonal: pooled row (k*B + b) = mean of image b's 4x4 block k = 2*ph + pw
    p = np.zeros((4 * b_tile, Q2 * b_tile), np.float32)
    for b in range(b_tile):
        for oh in range(HO):
            for ow in range(WO):
                k = (oh // 4) * 2 + (ow // 4)
                p[k * b_tile + b, b * Q2 + GW * oh + ow] = 1.0 / 16.0
    return p


def _prep_weights(params):
    # conv1 (O=64, I=3, 7, 7) -> im2col weight (K1P, 64); K index = kh*21 + kw*3 + i.
    w1 = jnp.transpose(params["w1"], (2, 3, 1, 0)).reshape(K1, C1)
    w1 = jnp.pad(w1, ((0, K1P - K1), (0, 0))).astype(jnp.bfloat16)
    # conv2 (O=128, I=64, 3, 3) -> 9 taps of (64, 128).
    w2 = jnp.transpose(params["w2"], (2, 3, 1, 0)).reshape(9, C1, C2).astype(jnp.bfloat16)
    # fc (2, 512) with torch flatten order j = c*4 + (ph*2 + pw) -> (4, 128, 2), f32.
    wfc = jnp.transpose(params["wfc"].reshape(2, C2, 4), (2, 1, 0))
    return w1, w2, wfc


def _im2col_conv1(x_nchw, n_pad):
    # Gather 7x7x3 patches for each conv1 output pixel and lay the rows out directly on
    # the zero-padded stride-16 grid that conv2 reads (row p = 16*(oh+1) + (ow+1)).
    n = x_nchw.shape[0]
    x = jnp.transpose(x_nchw, (0, 2, 3, 1))                        # (n, 16, 16, 3)
    xp = jnp.pad(x, ((0, 0), (3, 3), (3, 3), (0, 0)))              # (n, 22, 22, 3)
    oh = np.arange(HO)
    kk = np.arange(7)
    rows = 2 * oh[:, None] + kk[None, :]                           # (8, 7)
    patches = xp[:, rows[:, None, :, None], rows[None, :, None, :], :]  # (n,8,8,7,7,3)
    patches = patches.reshape(n, HO, WO, K1)
    patches = jnp.pad(patches, ((0, 0), (1, 1), (1, GW - 1 - WO), (0, 0)))  # (n,10,16,K1)
    xcol = patches.reshape(n, S1, K1)
    xcol = jnp.pad(xcol, ((0, n_pad - n), (0, 0), (0, K1P - K1))).astype(jnp.bfloat16)
    return xcol                                                    # (n_pad, 160, 256)


def init_params(key):
    ks = jax.random.split(key, 6)
    return dict(
        w1=jax.random.normal(ks[0], (64, 3, 7, 7), jnp.float32) * 0.05,
        b1=jax.random.normal(ks[1], (64,), jnp.float32) * 0.05,
        w2=jax.random.normal(ks[2], (128, 64, 3, 3), jnp.float32) * 0.05,
        b2=jax.random.normal(ks[3], (128,), jnp.float32) * 0.05,
        wfc=jax.random.normal(ks[4], (2, 512), jnp.float32) * 0.05,
        bfc=jax.random.normal(ks[5], (2,), jnp.float32) * 0.05,
    )


@jax.jit
def plain_cnn_forward(params, x_nchw):
    n = x_nchw.shape[0]
    assert x_nchw.shape[1:] == (C_IN, H, W)

    # Batch blocking: amortize per-step overhead while keeping >= 2 parallel grid steps
    # whenever n >= 2 (both v7x TensorCores stay busy; free on v5e/v6e).
    b_tile = max(1, min(8, n // 2))
    n_blocks = -(-n // b_tile)
    n_pad = n_blocks * b_tile

    xcol = _im2col_conv1(x_nchw, n_pad)                            # (n_pad, 160, 256) bf16
    w1, w2, wfc = _prep_weights(params)
    b1g = jnp.asarray(_valid_row_mask()) * params["b1"][None, :]   # (160, 64) f32
    b2 = params["b2"].reshape(1, C2)
    bfc = params["bfc"].reshape(1, 2)
    pool = jnp.asarray(_pool_matrix(b_tile))                       # (4B, 120B) f32

    flops = n_pad * (2 * S1 * K1P * C1 + 9 * 2 * Q2 * C1 * C2
                     + 2 * 4 * Q2 * C2 + 4 * 2 * C2 * 2)
    bytes_accessed = (2 * (xcol.size + w1.size + w2.size)
                      + 4 * (b1g.size + b2.size + bfc.size + pool.size + wfc.size)
                      + 4 * n_pad * 2)

    out = pl.pallas_call(
        _make_plain_cnn_kernel(b_tile),
        out_shape=jax.ShapeDtypeStruct((n_blocks, b_tile, 2), jnp.float32),
        grid=(n_blocks,),
        in_specs=[
            pl.BlockSpec((b_tile, S1, K1P), lambda i: (i, 0, 0)),        # per-step images
            pl.BlockSpec((S1, C1), lambda i: (0, 0)),                    # row-masked conv1 bias
            pl.BlockSpec((K1P, C1), lambda i: (0, 0)),                   # conv1 im2col weight
            pl.BlockSpec((9, C1, C2), lambda i: (0, 0, 0)),              # conv2 taps
            pl.BlockSpec((1, C2), lambda i: (0, 0)),                     # conv2 bias
            pl.BlockSpec((4 * b_tile, Q2 * b_tile), lambda i: (0, 0)),   # pool matrix
            pl.BlockSpec((4, C2, 2), lambda i: (0, 0, 0)),               # fc weight (per k)
            pl.BlockSpec((1, 2), lambda i: (0, 0)),                      # fc bias
        ],
        out_specs=pl.BlockSpec((None, b_tile, 2), lambda i: (i, 0, 0)),
        scratch_shapes=[
            pltpu.VMEM((b_tile, S1, C1), jnp.bfloat16),                  # GELU(conv1), padded grid
            pltpu.VMEM((b_tile * Q2, C2), jnp.float32),                  # conv2 accumulator
        ],
        compiler_params=pltpu.CompilerParams(
            dimension_semantics=("parallel",)),
        cost_estimate=pl.CostEstimate(
            flops=flops,
            transcendentals=n_pad * S1 * C1,
            bytes_accessed=bytes_accessed),
    )(xcol, b1g, w1, w2, b2, pool, wfc, bfc)

    return out.reshape(n_pad, 2)[:n]                               # (n, 2)


def reference_forward(params, x_nchw):
    """Pure-JAX (XLA) reference mirroring the PyTorch forward semantics."""
    dn1 = jax.lax.conv_dimension_numbers(x_nchw.shape, params["w1"].shape,
                                         ("NCHW", "OIHW", "NCHW"))
    y = jax.lax.conv_general_dilated(x_nchw, params["w1"], (2, 2),
                                     ((3, 3), (3, 3)), dimension_numbers=dn1,
                                     precision=jax.lax.Precision.HIGHEST)
    y = y + params["b1"].reshape(1, -1, 1, 1)
    y = 0.5 * y * (1.0 + jax.lax.erf(y * _INV_SQRT2))              # exact GELU
    dn2 = jax.lax.conv_dimension_numbers(y.shape, params["w2"].shape,
                                         ("NCHW", "OIHW", "NCHW"))
    y = jax.lax.conv_general_dilated(y, params["w2"], (1, 1),
                                     ((1, 1), (1, 1)), dimension_numbers=dn2,
                                     precision=jax.lax.Precision.HIGHEST)
    y = y + params["b2"].reshape(1, -1, 1, 1)
    n, ch, h, w = y.shape
    y = y.reshape(n, ch, 2, h // 2, 2, w // 2).mean(axis=(3, 5))   # AdaptiveAvgPool(2,2)
    flat = y.reshape(n, -1)                                        # torch (c, ph, pw) order
    return jnp.dot(flat, params["wfc"].T,
                   precision=jax.lax.Precision.HIGHEST) + params["bfc"]


if __name__ == "__main__":
    key = jax.random.PRNGKey(0)
    pkey, xkey = jax.random.split(key)
    params = init_params(pkey)
    x = jax.random.normal(xkey, (2, 3, 16, 16), jnp.float32)       # NCHW like PyTorch

    out = jax.block_until_ready(plain_cnn_forward(params, x))
    ref = jax.block_until_ready(reference_forward(params, x))

    assert out.shape == (2, 2), out.shape
    # bf16 matmul operands + single-pass MXU -> bf16-level error vs the f32 reference.
    assert np.allclose(np.asarray(out), np.asarray(ref), rtol=3e-2, atol=3e-2), (
        np.asarray(out), np.asarray(ref))
    print("KERNEL_OK")
</pallas_src>

<mosaic_0001>
module attributes {stable_mosaic.version = 11 : i64} {
  func.func @kernel(%arg0: i32, %arg1: memref<1x160x256xbf16, #tpu.memory_space<vmem>>, %arg2: memref<160x64xf32, #tpu.memory_space<vmem>>, %arg3: memref<256x64xbf16, #tpu.memory_space<vmem>>, %arg4: memref<9x64x128xbf16, #tpu.memory_space<vmem>>, %arg5: memref<1x128xf32, #tpu.memory_space<vmem>>, %arg6: memref<4x120xf32, #tpu.memory_space<vmem>>, %arg7: memref<4x128x2xf32, #tpu.memory_space<vmem>>, %arg8: memref<1x2xf32, #tpu.memory_space<vmem>>, %arg9: memref<1x1x2xf32, #tpu.memory_space<vmem>>, %arg10: memref<1x160x64xbf16, #tpu.memory_space<vmem>>, %arg11: memref<120x128xf32, #tpu.memory_space<vmem>>) attributes {dimension_semantics = [#tpu.dimension_semantics<parallel>], iteration_bounds = array<i64: 2>, scalar_prefetch = 0 : i64, scratch_operands = 2 : i64, tpu.core_type = #tpu.core_type<tc>, window_params = [{transform_indices = @transform_0, window_bounds = array<i64: 1, 160, 256>}, {pipeline_mode = #tpu.pipeline_mode<synchronous>, transform_indices = @transform_1, window_bounds = array<i64: 160, 64>}, {pipeline_mode = #tpu.pipeline_mode<synchronous>, transform_indices = @transform_2, window_bounds = array<i64: 256, 64>}, {pipeline_mode = #tpu.pipeline_mode<synchronous>, transform_indices = @transform_3, window_bounds = array<i64: 9, 64, 128>}, {pipeline_mode = #tpu.pipeline_mode<synchronous>, transform_indices = @transform_4, window_bounds = array<i64: 1, 128>}, {pipeline_mode = #tpu.pipeline_mode<synchronous>, transform_indices = @transform_5, window_bounds = array<i64: 4, 120>}, {pipeline_mode = #tpu.pipeline_mode<synchronous>, transform_indices = @transform_6, window_bounds = array<i64: 4, 128, 2>}, {pipeline_mode = #tpu.pipeline_mode<synchronous>, transform_indices = @transform_7, window_bounds = array<i64: 1, 2>}, {transform_indices = @transform_8, window_bounds = array<i64: 1, 1, 2>}]} {
    %c0 = arith.constant 0 : index
    %c0_0 = arith.constant 0 : index
    %c0_1 = arith.constant 0 : index
    %0 = vector.load %arg1[%c0, %c0_0, %c0_1] : memref<1x160x256xbf16, #tpu.memory_space<vmem>>, vector<1x160x256xbf16>
    %1 = vector.shape_cast %0 : vector<1x160x256xbf16> to vector<160x256xbf16>
    %c0_2 = arith.constant 0 : index
    %c0_3 = arith.constant 0 : index
    %2 = vector.load %arg3[%c0_2, %c0_3] : memref<256x64xbf16, #tpu.memory_space<vmem>>, vector<256x64xbf16>
    %cst = arith.constant dense<0.000000e+00> : vector<160x64xf32>
    %3 = tpu.matmul %1, %2, %cst {dimension_numbers = #tpu.dot_dimension_numbers<[1], [0], [0], [1], [0, 0, 1, 1], [], []>} : vector<160x256xbf16>, vector<256x64xbf16>, vector<160x64xf32> -> vector<160x64xf32>
    %4 = vector.shape_cast %3 : vector<160x64xf32> to vector<1x160x64xf32>
    %c0_4 = arith.constant 0 : index
    %c0_5 = arith.constant 0 : index
    %5 = vector.load %arg2[%c0_4, %c0_5] : memref<160x64xf32, #tpu.memory_space<vmem>>, vector<160x64xf32>
    %6 = vector.shape_cast %5 : vector<160x64xf32> to vector<1x160x64xf32>
    %7 = arith.addf %4, %6 : vector<1x160x64xf32>
    %cst_6 = arith.constant 5.000000e-01 : f32
    %8 = vector.broadcast %cst_6 : f32 to vector<1x160x64xf32>
    %9 = arith.mulf %8, %7 : vector<1x160x64xf32>
    %cst_7 = arith.constant 0.707106769 : f32
    %10 = vector.broadcast %cst_7 : f32 to vector<1x160x64xf32>
    %11 = arith.mulf %7, %10 : vector<1x160x64xf32>
    %12 = math.erf %11 : vector<1x160x64xf32>
    %cst_8 = arith.constant 1.000000e+00 : f32
    %13 = vector.broadcast %cst_8 : f32 to vector<1x160x64xf32>
    %14 = arith.addf %13, %12 : vector<1x160x64xf32>
    %15 = arith.mulf %9, %14 : vector<1x160x64xf32>
    %16 = arith.truncf %15 : vector<1x160x64xf32> to vector<1x160x64xbf16>
    %c0_9 = arith.constant 0 : index
    %c0_10 = arith.constant 0 : index
    %c0_11 = arith.constant 0 : index
    %17 = vector.load %arg10[%c0_9, %c0_10, %c0_11] : memref<1x160x64xbf16, #tpu.memory_space<vmem>>, vector<1x160x64xbf16>
    tpu.vector_store %arg10[%c0_9, %c0_10, %c0_11], %16 {strides = array<i32>} : memref<1x160x64xbf16, #tpu.memory_space<vmem>>, vector<1x160x64xbf16>,
    %c0_12 = arith.constant 0 : index
    %c0_13 = arith.constant 0 : index
    %c0_14 = arith.constant 0 : index
    %18 = vector.load %arg10[%c0_12, %c0_13, %c0_14] : memref<1x160x64xbf16, #tpu.memory_space<vmem>>, vector<1x120x64xbf16>
    %19 = vector.shape_cast %18 : vector<1x120x64xbf16> to vector<120x64xbf16>
    %c0_15 = arith.constant 0 : index
    %c0_16 = arith.constant 0 : index
    %c0_17 = arith.constant 0 : index
    %20 = vector.load %arg4[%c0_15, %c0_16, %c0_17] : memref<9x64x128xbf16, #tpu.memory_space<vmem>>, vector<1x64x128xbf16>
    %21 = vector.shape_cast %20 : vector<1x64x128xbf16> to vector<64x128xbf16>
    %cst_18 = arith.constant dense<0.000000e+00> : vector<120x128xf32>
    %22 = tpu.matmul %19, %21, %cst_18 {dimension_numbers = #tpu.dot_dimension_numbers<[1], [0], [0], [1], [0, 0, 1, 1], [], []>} : vector<120x64xbf16>, vector<64x128xbf16>, vector<120x128xf32> -> vector<120x128xf32>
    %c0_19 = arith.constant 0 : index
    %c0_20 = arith.constant 0 : index
    %23 = vector.load %arg11[%c0_19, %c0_20] : memref<120x128xf32, #tpu.memory_space<vmem>>, vector<120x128xf32>
    tpu.vector_store %arg11[%c0_19, %c0_20], %22 {strides = array<i32>} : memref<120x128xf32, #tpu.memory_space<vmem>>, vector<120x128xf32>,
    %c0_21 = arith.constant 0 : index
    %c1 = arith.constant 1 : index
    %c0_22 = arith.constant 0 : index
    %24 = vector.load %arg10[%c0_21, %c1, %c0_22] : memref<1x160x64xbf16, #tpu.memory_space<vmem>>, vector<1x120x64xbf16>
    %25 = vector.shape_cast %24 : vector<1x120x64xbf16> to vector<120x64xbf16>
    %c1_23 = arith.constant 1 : index
    %c0_24 = arith.constant 0 : index
    %c0_25 = arith.constant 0 : index
    %26 = vector.load %arg4[%c1_23, %c0_24, %c0_25] : memref<9x64x128xbf16, #tpu.memory_space<vmem>>, vector<1x64x128xbf16>
    %27 = vector.shape_cast %26 : vector<1x64x128xbf16> to vector<64x128xbf16>
    %cst_26 = arith.constant dense<0.000000e+00> : vector<120x128xf32>
    %28 = tpu.matmul %25, %27, %cst_26 {dimension_numbers = #tpu.dot_dimension_numbers<[1], [0], [0], [1], [0, 0, 1, 1], [], []>} : vector<120x64xbf16>, vector<64x128xbf16>, vector<120x128xf32> -> vector<120x128xf32>
    %c0_27 = arith.constant 0 : index
    %c0_28 = arith.constant 0 : index
    %29 = vector.load %arg11[%c0_27, %c0_28] : memref<120x128xf32, #tpu.memory_space<vmem>>, vector<120x128xf32>
    %30 = arith.addf %29, %28 : vector<120x128xf32>
    %c0_29 = arith.constant 0 : index
    %c0_30 = arith.constant 0 : index
    %31 = vector.load %arg11[%c0_29, %c0_30] : memref<120x128xf32, #tpu.memory_space<vmem>>, vector<120x128xf32>
    tpu.vector_store %arg11[%c0_29, %c0_30], %30 {strides = array<i32>} : memref<120x128xf32, #tpu.memory_space<vmem>>, vector<120x128xf32>,
    %c0_31 = arith.constant 0 : index
    %c2 = arith.constant 2 : index
    %c0_32 = arith.constant 0 : index
    %32 = vector.load %arg10[%c0_31, %c2, %c0_32] : memref<1x160x64xbf16, #tpu.memory_space<vmem>>, vector<1x120x64xbf16>
    %33 = vector.shape_cast %32 : vector<1x120x64xbf16> to vector<120x64xbf16>
    %c2_33 = arith.constant 2 : index
    %c0_34 = arith.constant 0 : index
    %c0_35 = arith.constant 0 : index
    %34 = vector.load %arg4[%c2_33, %c0_34, %c0_35] : memref<9x64x128xbf16, #tpu.memory_space<vmem>>, vector<1x64x128xbf16>
    %35 = vector.shape_cast %34 : vector<1x64x128xbf16> to vector<64x128xbf16>
    %cst_36 = arith.constant dense<0.000000e+00> : vector<120x128xf32>
    %36 = tpu.matmul %33, %35, %cst_36 {dimension_numbers = #tpu.dot_dimension_numbers<[1], [0], [0], [1], [0, 0, 1, 1], [], []>} : vector<120x64xbf16>, vector<64x128xbf16>, vector<120x128xf32> -> vector<120x128xf32>
    %c0_37 = arith.constant 0 : index
    %c0_38 = arith.constant 0 : index
    %37 = vector.load %arg11[%c0_37, %c0_38] : memref<120x128xf32, #tpu.memory_space<vmem>>, vector<120x128xf32>
    %38 = arith.addf %37, %36 : vector<120x128xf32>
    %c0_39 = arith.constant 0 : index
    %c0_40 = arith.constant 0 : index
    %39 = vector.load %arg11[%c0_39, %c0_40] : memref<120x128xf32, #tpu.memory_space<vmem>>, vector<120x128xf32>
    tpu.vector_store %arg11[%c0_39, %c0_40], %38 {strides = array<i32>} : memref<120x128xf32, #tpu.memory_space<vmem>>, vector<120x128xf32>,
    %c0_41 = arith.constant 0 : index
    %c16 = arith.constant 16 : index
    %c0_42 = arith.constant 0 : index
    %40 = vector.load %arg10[%c0_41, %c16, %c0_42] : memref<1x160x64xbf16, #tpu.memory_space<vmem>>, vector<1x120x64xbf16>
    %41 = vector.shape_cast %40 : vector<1x120x64xbf16> to vector<120x64xbf16>
    %c3 = arith.constant 3 : index
    %c0_43 = arith.constant 0 : index
    %c0_44 = arith.constant 0 : index
    %42 = vector.load %arg4[%c3, %c0_43, %c0_44] : memref<9x64x128xbf16, #tpu.memory_space<vmem>>, vector<1x64x128xbf16>
    %43 = vector.shape_cast %42 : vector<1x64x128xbf16> to vector<64x128xbf16>
    %cst_45 = arith.constant dense<0.000000e+00> : vector<120x128xf32>
    %44 = tpu.matmul %41, %43, %cst_45 {dimension_numbers = #tpu.dot_dimension_numbers<[1], [0], [0], [1], [0, 0, 1, 1], [], []>} : vector<120x64xbf16>, vector<64x128xbf16>, vector<120x128xf32> -> vector<120x128xf32>
    %c0_46 = arith.constant 0 : index
    %c0_47 = arith.constant 0 : index
    %45 = vector.load %arg11[%c0_46, %c0_47] : memref<120x128xf32, #tpu.memory_space<vmem>>, vector<120x128xf32>
    %46 = arith.addf %45, %44 : vector<120x128xf32>
    %c0_48 = arith.constant 0 : index
    %c0_49 = arith.constant 0 : index
    %47 = vector.load %arg11[%c0_48, %c0_49] : memref<120x128xf32, #tpu.memory_space<vmem>>, vector<120x128xf32>
    tpu.vector_store %arg11[%c0_48, %c0_49], %46 {strides = array<i32>} : memref<120x128xf32, #tpu.memory_space<vmem>>, vector<120x128xf32>,
    %c0_50 = arith.constant 0 : index
    %c17 = arith.constant 17 : index
    %c0_51 = arith.constant 0 : index
    %48 = vector.load %arg10[%c0_50, %c17, %c0_51] : memref<1x160x64xbf16, #tpu.memory_space<vmem>>, vector<1x120x64xbf16>
    %49 = vector.shape_cast %48 : vector<1x120x64xbf16> to vector<120x64xbf16>
    %c4 = arith.constant 4 : index
    %c0_52 = arith.constant 0 : index
    %c0_53 = arith.constant 0 : index
    %50 = vector.load %arg4[%c4, %c0_52, %c0_53] : memref<9x64x128xbf16, #tpu.memory_space<vmem>>, vector<1x64x128xbf16>
    %51 = vector.shape_cast %50 : vector<1x64x128xbf16> to vector<64x128xbf16>
    %cst_54 = arith.constant dense<0.000000e+00> : vector<120x128xf32>
    %52 = tpu.matmul %49, %51, %cst_54 {dimension_numbers = #tpu.dot_dimension_numbers<[1], [0], [0], [1], [0, 0, 1, 1], [], []>} : vector<120x64xbf16>, vector<64x128xbf16>, vector<120x128xf32> -> vector<120x128xf32>
    %c0_55 = arith.constant 0 : index
    %c0_56 = arith.constant 0 : index
    %53 = vector.load %arg11[%c0_55, %c0_56] : memref<120x128xf32, #tpu.memory_space<vmem>>, vector<120x128xf32>
    %54 = arith.addf %53, %52 : vector<120x128xf32>
    %c0_57 = arith.constant 0 : index
    %c0_58 = arith.constant 0 : index
    %55 = vector.load %arg11[%c0_57, %c0_58] : memref<120x128xf32, #tpu.memory_space<vmem>>, vector<120x128xf32>
    tpu.vector_store %arg11[%c0_57, %c0_58], %54 {strides = array<i32>} : memref<120x128xf32, #tpu.memory_space<vmem>>, vector<120x128xf32>,
    %c0_59 = arith.constant 0 : index
    %c18 = arith.constant 18 : index
    %c0_60 = arith.constant 0 : index
    %56 = vector.load %arg10[%c0_59, %c18, %c0_60] : memref<1x160x64xbf16, #tpu.memory_space<vmem>>, vector<1x120x64xbf16>
    %57 = vector.shape_cast %56 : vector<1x120x64xbf16> to vector<120x64xbf16>
    %c5 = arith.constant 5 : index
    %c0_61 = arith.constant 0 : index
    %c0_62 = arith.constant 0 : index
    %58 = vector.load %arg4[%c5, %c0_61, %c0_62] : memref<9x64x128xbf16, #tpu.memory_space<vmem>>, vector<1x64x128xbf16>
    %59 = vector.shape_cast %58 : vector<1x64x128xbf16> to vector<64x128xbf16>
    %cst_63 = arith.constant dense<0.000000e+00> : vector<120x128xf32>
    %60 = tpu.matmul %57, %59, %cst_63 {dimension_numbers = #tpu.dot_dimension_numbers<[1], [0], [0], [1], [0, 0, 1, 1], [], []>} : vector<120x64xbf16>, vector<64x128xbf16>, vector<120x128xf32> -> vector<120x128xf32>
    %c0_64 = arith.constant 0 : index
    %c0_65 = arith.constant 0 : index
    %61 = vector.load %arg11[%c0_64, %c0_65] : memref<120x128xf32, #tpu.memory_space<vmem>>, vector<120x128xf32>
    %62 = arith.addf %61, %60 : vector<120x128xf32>
    %c0_66 = arith.constant 0 : index
    %c0_67 = arith.constant 0 : index
    %63 = vector.load %arg11[%c0_66, %c0_67] : memref<120x128xf32, #tpu.memory_space<vmem>>, vector<120x128xf32>
    tpu.vector_store %arg11[%c0_66, %c0_67], %62 {strides = array<i32>} : memref<120x128xf32, #tpu.memory_space<vmem>>, vector<120x128xf32>,
    %c0_68 = arith.constant 0 : index
    %c32 = arith.constant 32 : index
    %c0_69 = arith.constant 0 : index
    %64 = vector.load %arg10[%c0_68, %c32, %c0_69] : memref<1x160x64xbf16, #tpu.memory_space<vmem>>, vector<1x120x64xbf16>
    %65 = vector.shape_cast %64 : vector<1x120x64xbf16> to vector<120x64xbf16>
    %c6 = arith.constant 6 : index
    %c0_70 = arith.constant 0 : index
    %c0_71 = arith.constant 0 : index
    %66 = vector.load %arg4[%c6, %c0_70, %c0_71] : memref<9x64x128xbf16, #tpu.memory_space<vmem>>, vector<1x64x128xbf16>
    %67 = vector.shape_cast %66 : vector<1x64x128xbf16> to vector<64x128xbf16>
    %cst_72 = arith.constant dense<0.000000e+00> : vector<120x128xf32>
    %68 = tpu.matmul %65, %67, %cst_72 {dimension_numbers = #tpu.dot_dimension_numbers<[1], [0], [0], [1], [0, 0, 1, 1], [], []>} : vector<120x64xbf16>, vector<64x128xbf16>, vector<120x128xf32> -> vector<120x128xf32>
    %c0_73 = arith.constant 0 : index
    %c0_74 = arith.constant 0 : index
    %69 = vector.load %arg11[%c0_73, %c0_74] : memref<120x128xf32, #tpu.memory_space<vmem>>, vector<120x128xf32>
    %70 = arith.addf %69, %68 : vector<120x128xf32>
    %c0_75 = arith.constant 0 : index
    %c0_76 = arith.constant 0 : index
    %71 = vector.load %arg11[%c0_75, %c0_76] : memref<120x128xf32, #tpu.memory_space<vmem>>, vector<120x128xf32>
    tpu.vector_store %arg11[%c0_75, %c0_76], %70 {strides = array<i32>} : memref<120x128xf32, #tpu.memory_space<vmem>>, vector<120x128xf32>,
    %c0_77 = arith.constant 0 : index
    %c33 = arith.constant 33 : index
    %c0_78 = arith.constant 0 : index
    %72 = vector.load %arg10[%c0_77, %c33, %c0_78] : memref<1x160x64xbf16, #tpu.memory_space<vmem>>, vector<1x120x64xbf16>
    %73 = vector.shape_cast %72 : vector<1x120x64xbf16> to vector<120x64xbf16>
    %c7 = arith.constant 7 : index
    %c0_79 = arith.constant 0 : index
    %c0_80 = arith.constant 0 : index
    %74 = vector.load %arg4[%c7, %c0_79, %c0_80] : memref<9x64x128xbf16, #tpu.memory_space<vmem>>, vector<1x64x128xbf16>
    %75 = vector.shape_cast %74 : vector<1x64x128xbf16> to vector<64x128xbf16>
    %cst_81 = arith.constant dense<0.000000e+00> : vector<120x128xf32>
    %76 = tpu.matmul %73, %75, %cst_81 {dimension_numbers = #tpu.dot_dimension_numbers<[1], [0], [0], [1], [0, 0, 1, 1], [], []>} : vector<120x64xbf16>, vector<64x128xbf16>, vector<120x128xf32> -> vector<120x128xf32>
    %c0_82 = arith.constant 0 : index
    %c0_83 = arith.constant 0 : index
    %77 = vector.load %arg11[%c0_82, %c0_83] : memref<120x128xf32, #tpu.memory_space<vmem>>, vector<120x128xf32>
    %78 = arith.addf %77, %76 : vector<120x128xf32>
    %c0_84 = arith.constant 0 : index
    %c0_85 = arith.constant 0 : index
    %79 = vector.load %arg11[%c0_84, %c0_85] : memref<120x128xf32, #tpu.memory_space<vmem>>, vector<120x128xf32>
    tpu.vector_store %arg11[%c0_84, %c0_85], %78 {strides = array<i32>} : memref<120x128xf32, #tpu.memory_space<vmem>>, vector<120x128xf32>,
    %c0_86 = arith.constant 0 : index
    %c34 = arith.constant 34 : index
    %c0_87 = arith.constant 0 : index
    %80 = vector.load %arg10[%c0_86, %c34, %c0_87] : memref<1x160x64xbf16, #tpu.memory_space<vmem>>, vector<1x120x64xbf16>
    %81 = vector.shape_cast %80 : vector<1x120x64xbf16> to vector<120x64xbf16>
    %c8 = arith.constant 8 : index
    %c0_88 = arith.constant 0 : index
    %c0_89 = arith.constant 0 : index
    %82 = vector.load %arg4[%c8, %c0_88, %c0_89] : memref<9x64x128xbf16, #tpu.memory_space<vmem>>, vector<1x64x128xbf16>
    %83 = vector.shape_cast %82 : vector<1x64x128xbf16> to vector<64x128xbf16>
    %cst_90 = arith.constant dense<0.000000e+00> : vector<120x128xf32>
    %84 = tpu.matmul %81, %83, %cst_90 {dimension_numbers = #tpu.dot_dimension_numbers<[1], [0], [0], [1], [0, 0, 1, 1], [], []>} : vector<120x64xbf16>, vector<64x128xbf16>, vector<120x128xf32> -> vector<120x128xf32>
    %c0_91 = arith.constant 0 : index
    %c0_92 = arith.constant 0 : index
    %85 = vector.load %arg11[%c0_91, %c0_92] : memref<120x128xf32, #tpu.memory_space<vmem>>, vector<120x128xf32>
    %86 = arith.addf %85, %84 : vector<120x128xf32>
    %c0_93 = arith.constant 0 : index
    %c0_94 = arith.constant 0 : index
    %87 = vector.load %arg11[%c0_93, %c0_94] : memref<120x128xf32, #tpu.memory_space<vmem>>, vector<120x128xf32>
    tpu.vector_store %arg11[%c0_93, %c0_94], %86 {strides = array<i32>} : memref<120x128xf32, #tpu.memory_space<vmem>>, vector<120x128xf32>,
    %c0_95 = arith.constant 0 : index
    %c0_96 = arith.constant 0 : index
    %88 = vector.load %arg6[%c0_95, %c0_96] : memref<4x120xf32, #tpu.memory_space<vmem>>, vector<4x120xf32>
    %c0_97 = arith.constant 0 : index
    %c0_98 = arith.constant 0 : index
    %89 = vector.load %arg11[%c0_97, %c0_98] : memref<120x128xf32, #tpu.memory_space<vmem>>, vector<120x128xf32>
    %cst_99 = arith.constant dense<0.000000e+00> : vector<4x128xf32>
    %90 = tpu.matmul %88, %89, %cst_99 {dimension_numbers = #tpu.dot_dimension_numbers<[1], [0], [0], [1], [0, 0, 1, 1], [], []>} : vector<4x120xf32>, vector<120x128xf32>, vector<4x128xf32> -> vector<4x128xf32>
    %c0_100 = arith.constant 0 : index
    %c0_101 = arith.constant 0 : index
    %91 = vector.load %arg5[%c0_100, %c0_101] : memref<1x128xf32, #tpu.memory_space<vmem>>, vector<1x128xf32>
    %92 = vector.broadcast %91 : vector<1x128xf32> to vector<4x128xf32>
    %93 = arith.addf %90, %92 : vector<4x128xf32>
    %cst_102 = arith.constant 0.000000e+00 : f32
    %94 = vector.broadcast %cst_102 : f32 to vector<1x2xf32>
    %95 = vector.extract_strided_slice %93 {offsets = [0, 0], sizes = [1, 128], strides = [1, 1]} : vector<4x128xf32> to vector<1x128xf32>
    %c0_103 = arith.constant 0 : index
    %c0_104 = arith.constant 0 : index
    %c0_105 = arith.constant 0 : index
    %96 = vector.load %arg7[%c0_103, %c0_104, %c0_105] : memref<4x128x2xf32, #tpu.memory_space<vmem>>, vector<1x128x2xf32>
    %97 = vector.shape_cast %96 : vector<1x128x2xf32> to vector<128x2xf32>
    %cst_106 = arith.constant dense<0.000000e+00> : vector<1x2xf32>
    %98 = tpu.matmul %95, %97, %cst_106 {dimension_numbers = #tpu.dot_dimension_numbers<[1], [0], [0], [1], [0, 0, 1, 1], [], []>} : vector<1x128xf32>, vector<128x2xf32>, vector<1x2xf32> -> vector<1x2xf32>
    %99 = arith.addf %94, %98 : vector<1x2xf32>
    %100 = vector.extract_strided_slice %93 {offsets = [1, 0], sizes = [1, 128], strides = [1, 1]} : vector<4x128xf32> to vector<1x128xf32>
    %c1_107 = arith.constant 1 : index
    %c0_108 = arith.constant 0 : index
    %c0_109 = arith.constant 0 : index
    %101 = vector.load %arg7[%c1_107, %c0_108, %c0_109] : memref<4x128x2xf32, #tpu.memory_space<vmem>>, vector<1x128x2xf32>
    %102 = vector.shape_cast %101 : vector<1x128x2xf32> to vector<128x2xf32>
    %cst_110 = arith.constant dense<0.000000e+00> : vector<1x2xf32>
    %103 = tpu.matmul %100, %102, %cst_110 {dimension_numbers = #tpu.dot_dimension_numbers<[1], [0], [0], [1], [0, 0, 1, 1], [], []>} : vector<1x128xf32>, vector<128x2xf32>, vector<1x2xf32> -> vector<1x2xf32>
    %104 = arith.addf %99, %103 : vector<1x2xf32>
    %105 = vector.extract_strided_slice %93 {offsets = [2, 0], sizes = [1, 128], strides = [1, 1]} : vector<4x128xf32> to vector<1x128xf32>
    %c2_111 = arith.constant 2 : index
    %c0_112 = arith.constant 0 : index
    %c0_113 = arith.constant 0 : index
    %106 = vector.load %arg7[%c2_111, %c0_112, %c0_113] : memref<4x128x2xf32, #tpu.memory_space<vmem>>, vector<1x128x2xf32>
    %107 = vector.shape_cast %106 : vector<1x128x2xf32> to vector<128x2xf32>
    %cst_114 = arith.constant dense<0.000000e+00> : vector<1x2xf32>
    %108 = tpu.matmul %105, %107, %cst_114 {dimension_numbers = #tpu.dot_dimension_numbers<[1], [0], [0], [1], [0, 0, 1, 1], [], []>} : vector<1x128xf32>, vector<128x2xf32>, vector<1x2xf32> -> vector<1x2xf32>
    %109 = arith.addf %104, %108 : vector<1x2xf32>
    %110 = vector.extract_strided_slice %93 {offsets = [3, 0], sizes = [1, 128], strides = [1, 1]} : vector<4x128xf32> to vector<1x128xf32>
    %c3_115 = arith.constant 3 : index
    %c0_116 = arith.constant 0 : index
    %c0_117 = arith.constant 0 : index
    %111 = vector.load %arg7[%c3_115, %c0_116, %c0_117] : memref<4x128x2xf32, #tpu.memory_space<vmem>>, vector<1x128x2xf32>
    %112 = vector.shape_cast %111 : vector<1x128x2xf32> to vector<128x2xf32>
    %cst_118 = arith.constant dense<0.000000e+00> : vector<1x2xf32>
    %113 = tpu.matmul %110, %112, %cst_118 {dimension_numbers = #tpu.dot_dimension_numbers<[1], [0], [0], [1], [0, 0, 1, 1], [], []>} : vector<1x128xf32>, vector<128x2xf32>, vector<1x2xf32> -> vector<1x2xf32>
    %114 = arith.addf %109, %113 : vector<1x2xf32>
    %c0_119 = arith.constant 0 : index
    %c0_120 = arith.constant 0 : index
    %115 = vector.load %arg8[%c0_119, %c0_120] : memref<1x2xf32, #tpu.memory_space<vmem>>, vector<1x2xf32>
    %116 = arith.addf %114, %115 : vector<1x2xf32>
    %c0_121 = arith.constant 0 : index
    %c0_122 = arith.constant 0 : index
    %c0_123 = arith.constant 0 : index
    %117 = vector.load %arg9[%c0_121, %c0_122, %c0_123] : memref<1x1x2xf32, #tpu.memory_space<vmem>>, vector<1x1x2xf32>
    %118 = vector.shape_cast %117 : vector<1x1x2xf32> to vector<1x2xf32>
    %119 = vector.shape_cast %116 : vector<1x2xf32> to vector<1x1x2xf32>
    tpu.vector_store %arg9[%c0_121, %c0_122, %c0_123], %119 {strides = array<i32>} : memref<1x1x2xf32, #tpu.memory_space<vmem>>, vector<1x1x2xf32>,
    return
  }
  func.func @transform_0(%arg0: i32) -> (i32, i32, i32) {
    %c0_i32 = arith.constant 0 : i32
    %c0_i32_0 = arith.constant 0 : i32
    %c0_i32_1 = arith.constant 0 : i32
    return %arg0, %c0_i32, %c0_i32_0 : i32, i32, i32
  }
  func.func @transform_1(%arg0: i32) -> (i32, i32) {
    %c0_i32 = arith.constant 0 : i32
    %c0_i32_0 = arith.constant 0 : i32
    %c0_i32_1 = arith.constant 0 : i32
    return %c0_i32, %c0_i32_0 : i32, i32
  }
  func.func @transform_2(%arg0: i32) -> (i32, i32) {
    %c0_i32 = arith.constant 0 : i32
    %c0_i32_0 = arith.constant 0 : i32
    %c0_i32_1 = arith.constant 0 : i32
    return %c0_i32, %c0_i32_0 : i32, i32
  }
  func.func @transform_3(%arg0: i32) -> (i32, i32, i32) {
    %c0_i32 = arith.constant 0 : i32
    %c0_i32_0 = arith.constant 0 : i32
    %c0_i32_1 = arith.constant 0 : i32
    %c0_i32_2 = arith.constant 0 : i32
    return %c0_i32, %c0_i32_0, %c0_i32_1 : i32, i32, i32
  }
  func.func @transform_4(%arg0: i32) -> (i32, i32) {
    %c0_i32 = arith.constant 0 : i32
    %c0_i32_0 = arith.constant 0 : i32
    %c0_i32_1 = arith.constant 0 : i32
    return %c0_i32, %c0_i32_0 : i32, i32
  }
  func.func @transform_5(%arg0: i32) -> (i32, i32) {
    %c0_i32 = arith.constant 0 : i32
    %c0_i32_0 = arith.constant 0 : i32
    %c0_i32_1 = arith.constant 0 : i32
    return %c0_i32, %c0_i32_0 : i32, i32
  }
  func.func @transform_6(%arg0: i32) -> (i32, i32, i32) {
    %c0_i32 = arith.constant 0 : i32
    %c0_i32_0 = arith.constant 0 : i32
    %c0_i32_1 = arith.constant 0 : i32
    %c0_i32_2 = arith.constant 0 : i32
    return %c0_i32, %c0_i32_0, %c0_i32_1 : i32, i32, i32
  }
  func.func @transform_7(%arg0: i32) -> (i32, i32) {
    %c0_i32 = arith.constant 0 : i32
    %c0_i32_0 = arith.constant 0 : i32
    %c0_i32_1 = arith.constant 0 : i32
    return %c0_i32, %c0_i32_0 : i32, i32
  }
  func.func @transform_8(%arg0: i32) -> (i32, i32, i32) {
    %c0_i32 = arith.constant 0 : i32
    %c0_i32_0 = arith.constant 0 : i32
    %c0_i32_1 = arith.constant 0 : i32
    return %arg0, %c0_i32, %c0_i32_0 : i32, i32, i32
  }
}

</mosaic_0001>

<bundles_post_ra>
// kernel: plain_cnn_forward.1
= control target key start
LH: loop header
LB: loop body
LE: loop exit
PB: predicated region body
PF: predicated region fallthrough
CT: control target
= control target key end

     0   :  { %13 = vsyncpa [#allocation5], 0  ;;  %s6394_s0 = inlined_call_operand.vmem [shape: bf16[2,160,256], index: 0, kind: input, shape index: {}]   ;;  %s6395_s1 = inlined_call_operand.vmem [shape: f32[160,64], index: 1, kind: input, shape index: {}]   ;;  %s6396_s2 = inlined_call_operand.vmem [shape: bf16[256,64], index: 2, kind: input, shape index: {}]   ;;  %s6397_s3 = inlined_call_operand.vmem [shape: bf16[9,64,128], index: 3, kind: input, shape index: {}]   ;;  %s6398_s4 = inlined_call_operand.vmem [shape: f32[1,128], index: 4, kind: input, shape index: {}]   ;;  %s6399_s5 = inlined_call_operand.vmem [shape: f32[4,120], index: 5, kind: input, shape index: {}]   ;;  %s6400_s6 = inlined_call_operand.vmem [shape: f32[4,128,2], index: 6, kind: input, shape index: {}]   ;;  %s6401_s7 = inlined_call_operand.vmem [shape: f32[1,2], index: 7, kind: input, shape index: {}]   ;;  %s6402_s8 = inlined_call_operand.hbm [shape: f32[2,1,2], index: 8, kind: output, shape index: {}]  }
   0x1   :  { %15 = vsyncpa [#allocation5 + $0x1], 0  ;;  %s5307_s27 = smov 0   ;;  %s5309_s28 = smov 0  }
   0x2   :  { %s5311_s29 = smov 0   ;;  %s5313_s30 = smov 0  }
   0x3 LB: > { %s5328_s9 = sadd.s32 4294967295, %s5257_s30   ;;  %s3914_s10 = sadd.s32 4294967294, %s5257_s30   ;;  %s5257_s30 = sphi %s5313_s30, %s6429_s30   ;;  %s5253_s29 = sphi %s5311_s29, %s6428_s29   ;;  %s5249_s28 = sphi %s5309_s28, %s6427_s28   ;;  %s5245_s27 = sphi %s5307_s27, %s6426_s27  }
   0x4   : > { %s5332_s11 = sadd.s32 1, %s5257_s30   ;;  %s201_s12 = sadd.s32 1, %s5253_s29 }
   0x5   : > { %s198_s13 = ssub.s32 %s5257_s30, %s5332_s11  ;;  %p211_p0 = scmp.ne.s32.totalorder %s5253_s29, %s5249_s28 }
   0x6   : > { %p199_p1 = scmp.eq.s32.totalorder %s198_s13, 0  ;;  %p212_p2 = scmp.eq.s32.totalorder %s5328_s9, 1 }
   0x7   : > { %p217_p3 = scmp.ne.s32.totalorder %s5249_s28, %s5245_s27  ;;  %p218_p4 = scmp.eq.s32.totalorder %s3914_s10, 1 }
   0x8   : > { %s5343_s14 = scalar_select %p199_p1, %s5253_s29, %s201_s12  }
   0x9   : > { %p5345_p5 = por %p212_p2, %p211_p0  ;;  %p5349_p6 = por %p218_p4, %p217_p3 }
   0xa   : > { %p3917_p7 = scmp.ge.s32.totalorder %s5257_s30, 1  ;;  %p265_p8 = scmp.lt.s32.totalorder %s5257_s30, 3 }
   0xc   : > { %p266_p9 = pnand %p3917_p7, %p265_p8 }
   0xe   : > { %269 = sbr.rel (%p266_p9) target bundleno = 1182 (0x49e), region = 52 }
  0x13   : > { %v4999_v0 = vld [vmem:[%s6396_s2 + $0x78] sm:$0xff]   ;;  %v5001_v2 = vld [vmem:[%s6396_s2 + $0x70] sm:$0xff]   ;;  %p298_p10 = scmp.lt.s32.totalorder %s5328_s9, 1  ;;  %v5003_v4 = vld [vmem:[%s6396_s2 + $0x68] sm:$0xff]   ;;  %vm885_vm0 = vcmask 519168   ;;  %vm991_vm1 = vcmask 523264  }
  0x14   : > { %v5000_v1 = vld [vmem:[%s6396_s2 + $0x38] sm:$0xff]   ;;  %4292 = vmatprep.subr.bf16.mxu0 %v4999_v0  ;;  %v5002_v3 = vld [vmem:[%s6396_s2 + $0x30] sm:$0xff]   ;;  %v5004_v5 = vld [vmem:[%s6396_s2 + $0x28] sm:$0xff]   ;;  %vm1510_vm2 = vcmask 1046528   ;;  %vm1192_vm3 = vsmask.f32 7424 }
  0x15   : > { %4293 = vmatpush3.bf16.msra.mxu0 %v5000_v1  ;;  %s299_s10 = scalar_select %p298_p10, %s5328_s9, 1  ;;  %v5005_v6 = vld [vmem:[%s6396_s2 + $0x60] sm:$0xff]   ;;  %v5007_v8 = vld [vmem:[%s6396_s2 + $0x58] sm:$0xff]   ;;  %v5009_v10 = vld [vmem:[%s6396_s2 + $0x50] sm:$0xff]   ;;  %vm5260_vm4 = vmmov 0   ;;  %vm3412_vm5 = vcmask 982016  }
  0x16   : > { %4294 = vmatprep.subr.bf16.mxu0 %v5001_v2  ;;  %v5006_v7 = vld [vmem:[%s6396_s2 + $0x20] sm:$0xff]   ;;  %v5008_v9 = vld [vmem:[%s6396_s2 + $0x18] sm:$0xff]   ;;  %v5010_v12 = vld [vmem:[%s6396_s2 + $0x10] sm:$0xff]   ;;  %s296_s21 = sand.u32 1, %s5249_s28   ;;  %vm3844_vm6 = vcmask 8192   ;;  %s5261_s20 = smov [#allocation4]  }
  0x17   : > { %s4957_s19 = smul.u32 160, %s299_s10  ;;  %v5011_v13 = vld [vmem:[%s6396_s2 + $0x48] sm:$0xff]   ;;  %v5013_v15 = vld [vmem:[%s6396_s2 + $0x40] sm:$0xff]   ;;  %v5045_v36 = vld [vmem:[%s6397_s3 + $0x18] sm:$0xff]   ;;  %s297_s24 = scalar_lea.vmem [#allocation4], %s296_s21 }
  0x18   : > { %v5012_v14 = vld [vmem:[%s6396_s2 + $0x8] sm:$0xff]   ;;  %v5014_v16 = vld [vmem:[%s6396_s2] sm:$0xff]   ;;  %4560 = vmatprep.subr.bf16.mxu1 %v5045_v36  ;;  %v5046_v37 = vld [vmem:[%s6397_s3 + $0x10] sm:$0xff]   ;;  %s3859_s25 = sshll.u32 %s297_s24, 4  ;;  %s3847_s17 = scalar_lea.sflag [#allocation5], %s296_s21  ;;  %s3860_s25 = int_to_ptr.vmem [resolvable:$true] %s3859_s25 }
  0x19   : > { %4295 = vmatpush3.bf16.msra.mxu0 %v5002_v3  ;;  %s5387_s26 = scalar_lea.vmem %s6394_s0, %s4957_s19  ;;  %4561 = vmatpush3.bf16.msra.mxu1 %v5045_v36  ;;  %v5047_v38 = vld [vmem:[%s6397_s3 + $0x8] sm:$0xff]   ;;  %v5049_v39 = vld [vmem:[%s6397_s3 + $0x78] sm:$0xff]   ;;  %v5050_v40 = vld [vmem:[%s6397_s3] sm:$0xff]   ;;  %s5197_s18 = scalar_lea.vmem %s3860_s25, 16 }
  0x1a   : > { %4296 = vmatprep.subr.bf16.mxu0 %v5003_v4  ;;  %v5017_v11 = vld [vmem:[%s5387_s26 + $0x4] ss:$8 sps:$4 sm:$0xff]   ;;  %v5015_v17 = vld [vmem:[%s5387_s26] ss:$8 sps:$4 sm:$0xff]   ;;  %v5018_v18 = vld [vmem:[%s5387_s26 + $0x14] ss:$8 sps:$4 sm:$0xff]   ;;  %4562 = vmatprep.subr.bf16.mxu1 %v5046_v37  ;;  %p5198_p11 = scmp.ne.s32.totalorder %s3860_s25, %s5197_s18 }
  0x1b   : > { %584 = vmatprep.mubr.bf16.mxu0 %v5017_v11  ;;  %v5020_v19 = vld [vmem:[%s5387_s26 + $0x10] ss:$8 sps:$4 sm:$0xff]   ;;  %v5021_v20 = vld [vmem:[%s5387_s26 + $0x24] ss:$8 sps:$4 sm:$0xff]   ;;  %v5023_v21 = vld [vmem:[%s5387_s26 + $0x20] ss:$8 sps:$4 sm:$0xff]  }
  0x1c   : > { %v5024_v22 = vld [vmem:[%s5387_s26 + $0x34] ss:$8 sps:$4 sm:$0xff]   ;;  %v5026_v23 = vld [vmem:[%s5387_s26 + $0x30] ss:$8 sps:$4 sm:$0xff]   ;;  %v5027_v24 = vld [vmem:[%s5387_s26 + $0x44] ss:$8 sps:$4 sm:$0xff]   ;;  %p5199_p12 = pnand %p5198_p11, %p5345_p5 }
  0x1d   : > { %4297 = vmatpush3.bf16.msra.mxu0 %v5004_v5  ;;  %v5029_v25 = vld [vmem:[%s5387_s26 + $0x40] ss:$8 sps:$4 sm:$0xff]   ;;  %v5030_v26 = vld [vmem:[%s5387_s26 + $0x54] ss:$8 sps:$4 sm:$0xff]   ;;  %v5032_v27 = vld [vmem:[%s5387_s26 + $0x50] ss:$8 sps:$4 sm:$0xff]   ;;  %4563 = vmatpush3.bf16.msra.mxu1 %v5046_v37 }
  0x1e   : > { %4298 = vmatprep.subr.bf16.mxu0 %v5005_v6  ;;  %v5033_v28 = vld [vmem:[%s5387_s26 + $0x64] ss:$8 sps:$4 sm:$0xff]   ;;  %v5035_v29 = vld [vmem:[%s5387_s26 + $0x60] ss:$8 sps:$4 sm:$0xff]   ;;  %v5036_v30 = vld [vmem:[%s5387_s26 + $0x74] ss:$8 sps:$4 sm:$0xff]   ;;  %4564 = vmatprep.subr.bf16.mxu1 %v5047_v38  ;;  %p5200_p13 = pneg %p5199_p12 }
  0x1f   : > { %v5038_v31 = vld [vmem:[%s5387_s26 + $0x70] ss:$8 sps:$4 sm:$0xff]   ;;  %v5039_v32 = vld [vmem:[%s5387_s26 + $0x84] ss:$8 sps:$4 sm:$0xff]   ;;  %v5041_v33 = vld [vmem:[%s5387_s26 + $0x80] ss:$8 sps:$4 sm:$0xff]  }
  0x20   : > { %v5042_v34 = vld [vmem:[%s5387_s26 + $0x94] ss:$8 sps:$4 sm:$0xff]   ;;  %v5044_v35 = vld [vmem:[%s5387_s26 + $0x90] ss:$8 sps:$4 sm:$0xff]   ;;  %v5053_v42 = vld [vmem:[%s6397_s3 + $0x68] sm:$0xff]   ;;  %s4269_s26 = sshll.u32 %s5328_s9, 4 }
  0x21   : > { %4299 = vmatpush3.bf16.msra.mxu0 %v5006_v7  ;;  %4565 = vmatpush3.bf16.msra.mxu1 %v5047_v38  ;;  %v5051_v41 = vld [vmem:[%s6397_s3 + $0x70] sm:$0xff]   ;;  %v5055_v43 = vld [vmem:[%s6397_s3 + $0x60] sm:$0xff]   ;;  %v5457_v44 = vld [vmem:[%s6397_s3 + $0xb8] sm:$0xff]   ;;  %s3857_s10 = scalar_lea.hbm %s6402_s8, %s4269_s26  ;;  %s5201_s19 = sshll.u32 %s5261_s20, 4  ;;  %s5202_s19 = int_to_ptr.vmem [resolvable:$false] %s5201_s19 }
  0x22   : > { %4300 = vmatprep.subr.bf16.mxu0 %v5007_v8  ;;  %4566 = vmatprep.subr.bf16.mxu1 %v5050_v40  ;;  %v5463_v45 = vld [vmem:[%s6397_s3 + $0x38] sm:$0xff]   ;;  %v665_v48 = vld [vmem:[%s6395_s1] sm:$0xff]  ;;  %v666_v53 = vld [vmem:[%s6395_s1 + $0x8] sm:$0xff]  ;;  %s5203_s9 = scalar_lea.vmem %s5202_s19, 32  ;;  %p5204_p0 = scmp.lt.s32.totalorder %s3860_s25, %s5202_s19 }
  0x23   : > { %v667_v59 = vld [vmem:[%s6395_s1 + $0x10] sm:$0xff]  ;;  %v668_v1 = vld [vmem:[%s6395_s1 + $0x18] sm:$0xff]  ;;  %v669_v7 = vld [vmem:[%s6395_s1 + $0x20] sm:$0xff]  ;;  %p5205_p1 = scmp.lt.s32.totalorder %s5203_s9, %s5197_s18 }
  0x25   : > { %4301 = vmatpush3.bf16.msra.mxu0 %v5008_v9  ;;  %4567 = vmatpush3.bf16.msra.mxu1 %v5050_v40  ;;  %p5206_p2 = por %p5205_p1, %p5204_p0 }
  0x26   : > { %4302 = vmatprep.subr.bf16.mxu0 %v5009_v10  ;;  %4584 = vmatprep.subr.bf16.mxu1 %v5463_v45 }
  0x27   : > { %p5207_p3 = pnand %p5206_p2, %p5200_p13 }
  0x29   : > { %4303 = vmatpush3.bf16.msra.mxu0 %v5010_v12 }
  0x2a   : > { %4304 = vmatprep.subr.bf16.mxu0 %v5011_v13 }
  0x2d   : > { %4305 = vmatpush3.bf16.msra.mxu0 %v5012_v14  ;;  %v670_v14 = vld [vmem:[%s6395_s1 + $0x28] sm:$0xff] }
  0x2e   : > { %4306 = vmatprep.subr.bf16.mxu0 %v5013_v15 }
  0x31   : > { %4307 = vmatpush3.bf16.msra.mxu0 %v5014_v16 }
  0x32   : > { %4632 = vmatprep.subr.bf16.mxu0 %v5049_v39 }
  0x34   : > { %585 = vmatmul.mubr.bf16.vlgmr.msra.gmra.mxu0 %v5015_v17 }
  0x35   : > { %592 = vmatprep.mubr.bf16.mxu0 %v5018_v18  ;;  %4633 = vmatpush3.bf16.msra.mxu0 %v5049_v39 }
  0x36   : > { %4634 = vmatprep.subr.bf16.mxu0 %v5051_v41 }
  0x39   : > { %4635 = vmatpush3.bf16.msra.mxu0 %v5051_v41 }
  0x3a   : > { %4636 = vmatprep.subr.bf16.mxu0 %v5053_v42 }
  0x3c   : > { %593 = vmatmul.mubr.bf16.gmra.mxu0 %v5020_v19 }
  0x3d   : > { %600 = vmatprep.mubr.bf16.mxu0 %v5021_v20  ;;  %4637 = vmatpush3.bf16.msra.mxu0 %v5053_v42 }
  0x3e   : > { %4638 = vmatprep.subr.bf16.mxu0 %v5055_v43 }
  0x41   : > { %4639 = vmatpush3.bf16.msra.mxu0 %v5055_v43 }
  0x42   : > { %4680 = vmatprep.subr.bf16.mxu0 %v5457_v44 }
  0x44   : > { %601 = vmatmul.mubr.bf16.gmra.mxu0 %v5023_v21 }
  0x45   : > { %608 = vmatprep.mubr.bf16.mxu0 %v5024_v22 }
  0x4c   : > { %609 = vmatmul.mubr.bf16.gmra.mxu0 %v5026_v23 }
  0x4d   : > { %616 = vmatprep.mubr.bf16.mxu0 %v5027_v24 }
  0x54   : > { %617 = vmatmul.mubr.bf16.gmra.mxu0 %v5029_v25 }
  0x55   : > { %624 = vmatprep.mubr.bf16.mxu0 %v5030_v26 }
  0x5c   : > { %625 = vmatmul.mubr.bf16.gmra.mxu0 %v5032_v27 }
  0x5d   : > { %632 = vmatprep.mubr.bf16.mxu0 %v5033_v28  ;;  %v671_v28 = vld [vmem:[%s6395_s1 + $0x30] sm:$0xff] }
  0x64   : > { %633 = vmatmul.mubr.bf16.gmra.mxu0 %v5035_v29 }
  0x65   : > { %640 = vmatprep.mubr.bf16.mxu0 %v5036_v30 }
  0x6c   : > { %641 = vmatmul.mubr.bf16.gmra.mxu0 %v5038_v31 }
  0x6d   : > { %648 = vmatprep.mubr.bf16.mxu0 %v5039_v32 }
  0x74   : > { %649 = vmatmul.mubr.bf16.gmra.mxu0 %v5041_v33 }
  0x75   : > { %656 = vmatprep.mubr.bf16.mxu0 %v5042_v34 }
  0x7c   : > { %657 = vmatmul.mubr.bf16.gmra.mxu0 %v5044_v35  ;;  %v672_v35 = vld [vmem:[%s6395_s1 + $0x38] sm:$0xff] }
  0xf4   : > { %v4308_v46 = vpop.f32.mrf.mxu0 }
  0xf6   : > { %v4309_v47 = vpop.f32.mrf.mxu0 }
  0xf7   : > { %v4310_v49 = vadd.f32 %v4309_v47, %v4308_v46 }
  0xf8   : > { %v4311_v50 = vpop.f32.mrf.mxu0 }
  0xf9   : > { %v685_v51 = vadd.f32 %v4310_v49, %v665_v48 }
  0xfa   : > { %v4312_v52 = vpop.f32.mrf.mxu0 }
  0xfb   : > { %v725_v54 = vmul.f32 0.70710677, %v685_v51  ;;  %v4313_v55 = vadd.f32 %v4312_v52, %v4311_v50  ;;  %v705_v15 = vmul.f32 0.5, %v685_v51  ;;  %v673_v52 = vld [vmem:[%s6395_s1 + $0x40] sm:$0xff] }
  0xfc   : > { %v4314_v56 = vpop.f32.mrf.mxu0 }
  0xfd   : > { %5153 = verf.f32 %v725_v54  ;;  %v686_v57 = vadd.f32 %v4313_v55, %v666_v53 }
  0xfe   : > { %v4315_v58 = vpop.f32.mrf.mxu0 }
  0xff   : > { %v726_v60 = vmul.f32 0.70710677, %v686_v57  ;;  %v4316_v61 = vadd.f32 %v4315_v58, %v4314_v56  ;;  %v706_v25 = vmul.f32 0.5, %v686_v57 }
 0x100   : > { %v4317_v62 = vpop.f32.mrf.mxu0 }
 0x101   : > { %5155 = verf.f32 %v726_v60  ;;  %v687_v63 = vadd.f32 %v4316_v61, %v667_v59  ;;  %v674_v59 = vld [vmem:[%s6395_s1 + $0x48] sm:$0xff] }
 0x102   : > { %v4318_v0 = vpop.f32.mrf.mxu0 }
 0x103   : > { %v727_v2 = vmul.f32 0.70710677, %v687_v63  ;;  %v4319_v3 = vadd.f32 %v4318_v0, %v4317_v62  ;;  %v707_v37 = vmul.f32 0.5, %v687_v63 }
 0x104   : > { %v4320_v4 = vpop.f32.mrf.mxu0 }
 0x105   : > { %5157 = verf.f32 %v727_v2  ;;  %v688_v5 = vadd.f32 %v4319_v3, %v668_v1 }
 0x106   : > { %v4321_v6 = vpop.f32.mrf.mxu0 }
 0x107   : > { %v728_v8 = vmul.f32 0.70710677, %v688_v5  ;;  %v4322_v9 = vadd.f32 %v4321_v6, %v4320_v4  ;;  %v708_v49 = vmul.f32 0.5, %v688_v5 }
 0x108   : > { %v4323_v10 = vpop.f32.mrf.mxu0 }
 0x109   : > { %5159 = verf.f32 %v728_v8  ;;  %v689_v11 = vadd.f32 %v4322_v9, %v669_v7 }
 0x10a   : > { %v5154_v12 = vpop.eup %5153  ;;  %v4324_v13 = vpop.f32.mrf.mxu0 }
 0x10b   : > { %v765_v16 = vadd.f32 1.0, %v5154_v12  ;;  %v729_v17 = vmul.f32 0.70710677, %v689_v11  ;;  %v4325_v18 = vadd.f32 %v4324_v13, %v4323_v10  ;;  %v709_v61 = vmul.f32 0.5, %v689_v11  ;;  %v675_v11 = vld [vmem:[%s6395_s1 + $0x50] sm:$0xff] }
 0x10c   : > { %v4326_v19 = vpop.f32.mrf.mxu0 }
 0x10d   : > { %v785_v20 = vmul.f32 %v765_v16, %v705_v15  ;;  %5161 = verf.f32 %v729_v17  ;;  %v690_v21 = vadd.f32 %v4325_v18, %v670_v14  ;;  %v676_v17 = vld [vmem:[%s6395_s1 + $0x58] sm:$0xff] }
 0x10e   : > { %v5156_v22 = vpop.eup %5155  ;;  %v4327_v23 = vpop.f32.mrf.mxu0 }
 0x10f   : > { %v4272_v24 = vpack.c.bf16 %v785_v20, %v785_v20  ;;  %v766_v26 = vadd.f32 1.0, %v5156_v22  ;;  %v730_v27 = vmul.f32 0.70710677, %v690_v21  ;;  %v4328_v29 = vadd.f32 %v4327_v23, %v4326_v19 }
 0x110   : > { %v4329_v30 = vpop.f32.mrf.mxu0  ;;  %v710_v8 = vmul.f32 0.5, %v690_v21  ;;  %v5069_v21 = vld [vmem:[%s6397_s3 + $0x30] sm:$0xff]  }
 0x111   : > { %886 = vst.msk [vmem:[#allocation2] sm:$0xf] %vm885_vm0, %v4272_v24  ;;  %v786_v31 = vmul.f32 %v766_v26, %v706_v25  ;;  %5163 = verf.f32 %v730_v27  ;;  %v691_v33 = vadd.f32 %v4328_v29, %v671_v28 }
 0x112   : > { %v5158_v32 = vpop.eup %5157  ;;  %v4330_v34 = vpop.f32.mrf.mxu0 }
 0x113   : > { %v4273_v36 = vpack.c.bf16 %v786_v31, %v786_v31  ;;  %v767_v38 = vadd.f32 1.0, %v5158_v32  ;;  %v4331_v39 = vadd.f32 %v4330_v34, %v4329_v30  ;;  %v731_v40 = vmul.f32 0.70710677, %v691_v33  ;;  %v677_v32 = vld [vmem:[%s6395_s1 + $0x60] sm:$0xff] }
 0x114   : > { %v4332_v41 = vpop.f32.mrf.mxu0  ;;  %v711_v22 = vmul.f32 0.5, %v691_v33 }
 0x115   : > { %887 = vst.msk [vmem:[#allocation2 + $0x4] sm:$0xf] %vm885_vm0, %v4273_v36  ;;  %v787_v42 = vmul.f32 %v767_v38, %v707_v37  ;;  %v692_v43 = vadd.f32 %v4331_v39, %v672_v35  ;;  %5165 = verf.f32 %v731_v40 }
 0x116   : > { %v5160_v46 = vpop.eup %5159  ;;  %v4333_v47 = vpop.f32.mrf.mxu0 }
 0x117   : > { %v4274_v48 = vpack.c.bf16 %v787_v42, %v787_v42  ;;  %v768_v50 = vadd.f32 1.0, %v5160_v46  ;;  %v732_v51 = vmul.f32 0.70710677, %v692_v43  ;;  %v4334_v53 = vadd.f32 %v4333_v47, %v4332_v41  ;;  %v5073_v41 = vld [vmem:[%s6397_s3 + $0x28] sm:$0xff]  }
 0x118   : > { %v4335_v54 = vpop.f32.mrf.mxu0  ;;  %v712_v34 = vmul.f32 0.5, %v692_v43  ;;  %v678_v43 = vld [vmem:[%s6395_s1 + $0x68] sm:$0xff] }
 0x119   : > { %888 = vst.msk [vmem:[#allocation2 + $0x8] sm:$0xf] %vm885_vm0, %v4274_v48  ;;  %v788_v55 = vmul.f32 %v768_v50, %v708_v49  ;;  %5167 = verf.f32 %v732_v51  ;;  %v5496_v57 = vadd.f32 %v4334_v53, %v673_v52  ;;  %v5061_v50 = vld [vmem:[%s6397_s3 + $0xb0] sm:$0xff]  }
 0x11a   : > { %v5162_v56 = vpop.eup %5161  ;;  %v4336_v58 = vpop.f32.mrf.mxu0 }
 0x11b   : > { %v4275_v60 = vpack.c.bf16 %v788_v55, %v788_v55  ;;  %v769_v62 = vadd.f32 1.0, %v5162_v56  ;;  %v4337_v63 = vadd.f32 %v4336_v58, %v4335_v54  ;;  %v733_v0 = vmul.f32 0.70710677, %v5496_v57  ;;  %v5078_v56 = vld [vmem:[%s6397_s3 + $0x20] sm:$0xff]  }
 0x11c   : > { %v4338_v1 = vpop.f32.mrf.mxu0  ;;  %v5048_v2 = vld [vmem:[#allocation2] sm:$0xff]  }
 0x11d   : > { %889 = vst.msk [vmem:[#allocation2 + $0xc] sm:$0xf] %vm885_vm0, %v4275_v60  ;;  %v789_v3 = vmul.f32 %v769_v62, %v709_v61  ;;  %v5503_v4 = vadd.f32 %v4337_v63, %v674_v59  ;;  %5169 = verf.f32 %v733_v0  ;;  %4568 = vmatprep.mubr.msk.bf16.mxu1 %vm991_vm1, %v5048_v2  ;;  %v679_v60 = vld [vmem:[%s6395_s1 + $0x70] sm:$0xff] }
 0x11e   : > { %v5164_v5 = vpop.eup %5163  ;;  %v4339_v6 = vpop.f32.mrf.mxu0 }
 0x11f   : > { %v4276_v7 = vpack.c.bf16 %v789_v3, %v789_v3  ;;  %v770_v9 = vadd.f32 1.0, %v5164_v5  ;;  %v734_v10 = vmul.f32 0.70710677, %v5503_v4  ;;  %v4340_v12 = vadd.f32 %v4339_v6, %v4338_v1  ;;  %v5065_v1 = vld [vmem:[%s6397_s3 + $0xa8] sm:$0xff]   ;;  %v5564_v5 = vld [vmem:[%s6397_s3 + $0x58] sm:$0xff]  }
 0x120   : > { %v4341_v13 = vpop.f32.mrf.mxu0  ;;  %v714_v61 = vmul.f32 0.5, %v5503_v4 }
 0x121   : > { %890 = vst.msk [vmem:[#allocation2 + $0x10] sm:$0xf] %vm885_vm0, %v4276_v7  ;;  %v790_v14 = vmul.f32 %v770_v9, %v710_v8  ;;  %5171 = verf.f32 %v734_v10  ;;  %v5511_v15 = vadd.f32 %v4340_v12, %v675_v11  ;;  %v680_v8 = vld [vmem:[%s6395_s1 + $0x78] sm:$0xff] }
 0x122   : > { %v4342_v16 = vpop.f32.mrf.mxu0  ;;  %v5166_v18 = vpop.eup %5165 }
 0x123   : > { %v4277_v19 = vpack.c.bf16 %v790_v14, %v790_v14  ;;  %v4343_v20 = vadd.f32 %v4342_v16, %v4341_v13  ;;  %v771_v23 = vadd.f32 1.0, %v5166_v18  ;;  %v735_v24 = vmul.f32 0.70710677, %v5511_v15 }
 0x124   : > { %v4344_v25 = vpop.f32.mrf.mxu0  ;;  %v5052_v27 = vld [vmem:[#allocation2 + $0x8] sm:$0xff]   ;;  %v715_v10 = vmul.f32 0.5, %v5511_v15 }
 0x125   : > { %891 = vst.msk [vmem:[#allocation2 + $0x14] sm:$0xf] %vm885_vm0, %v4277_v19  ;;  %v5521_v26 = vadd.f32 %v4343_v20, %v676_v17  ;;  %v5054_v28 = vld [vmem:[#allocation2 + $0x8] sm:$0xff]   ;;  %v791_v30 = vmul.f32 %v771_v23, %v711_v22  ;;  %5173 = verf.f32 %v735_v24  ;;  %4569 = vmatmul.mubr.msk.bf16.vlgmr.msra.gmra.mxu1 %vm991_vm1, %v5052_v27  ;;  %v5068_v19 = vld [vmem:[%s6397_s3 + $0xa0] sm:$0xff]  }
 0x126   : > { %v5168_v29 = vpop.eup %5167  ;;  %v4345_v31 = vpop.f32.mrf.mxu0  ;;  %4640 = vmatprep.mubr.msk.bf16.mxu0 %vm991_vm1, %v5054_v28  ;;  %4585 = vmatpush3.bf16.msra.mxu1 %v5463_v45  ;;  %v713_v45 = vmul.f32 0.5, %v5496_v57  ;;  %v681_v22 = vld [vmem:[%s6395_s1 + $0x80] sm:$0xff] }
 0x127   : > { %v772_v33 = vadd.f32 1.0, %v5168_v29  ;;  %v736_v35 = vmul.f32 0.70710677, %v5521_v26  ;;  %v4346_v36 = vadd.f32 %v4345_v31, %v4344_v25  ;;  %v4278_v37 = vpack.c.bf16 %v791_v30, %v791_v30  ;;  %4586 = vmatprep.subr.bf16.mxu1 %v5069_v21  ;;  %v5593_v29 = vld [vmem:[%s6397_s3 + $0xf8] sm:$0xff]  }
 0x128   : > { %v4347_v38 = vpop.f32.mrf.mxu0  ;;  %v716_v23 = vmul.f32 0.5, %v5521_v26 }
 0x129   : > { %v792_v39 = vmul.f32 %v772_v33, %v712_v34  ;;  %5175 = verf.f32 %v736_v35  ;;  %v5530_v40 = vadd.f32 %v4346_v36, %v677_v32  ;;  %892 = vst.msk [vmem:[#allocation2 + $0x18] sm:$0xf] %vm885_vm0, %v4278_v37  ;;  %v5066_v32 = vld [vmem:[#allocation2 + $0x8] sm:$0xfe]  }
 0x12a   : > { %v4348_v42 = vpop.f32.mrf.mxu0  ;;  %v5170_v46 = vpop.eup %5169  ;;  %4587 = vmatpush3.bf16.msra.mxu1 %v5069_v21  ;;  %v682_v37 = vld [vmem:[%s6395_s1 + $0x88] sm:$0xff] }
 0x12b   : > { %v4279_v47 = vpack.c.bf16 %v792_v39, %v792_v39  ;;  %v737_v48 = vmul.f32 0.70710677, %v5530_v40  ;;  %v4349_v49 = vadd.f32 %v4348_v42, %v4347_v38  ;;  %v773_v51 = vadd.f32 1.0, %v5170_v46  ;;  %4588 = vmatprep.subr.bf16.mxu1 %v5073_v41 }
 0x12c   : > { %v4350_v52 = vpop.f32.mrf.mxu0  ;;  %v5056_v53 = vld [vmem:[#allocation2 + $0x10] sm:$0xff]   ;;  %v717_v35 = vmul.f32 0.5, %v5530_v40 }
 0x12d   : > { %893 = vst.msk [vmem:[#allocation2 + $0x1c] sm:$0xf] %vm885_vm0, %v4279_v47  ;;  %5177 = verf.f32 %v737_v48  ;;  %v5545_v54 = vadd.f32 %v4349_v49, %v678_v43  ;;  %v5057_v55 = vld [vmem:[#allocation2 + $0x10] sm:$0xff]   ;;  %v793_v58 = vmul.f32 %v773_v51, %v713_v45  ;;  %4572 = vmatprep.mubr.msk.bf16.mxu1 %vm991_vm1, %v5056_v53  ;;  %v2348_v48 = vrot.slane %v5066_v32, 1 }
 0x12e   : > { %v5172_v57 = vpop.eup %5171  ;;  %v4351_v59 = vpop.f32.mrf.mxu0  ;;  %4641 = vmatmul.mubr.msk.bf16.vlgmr.msra.gmra.mxu0 %vm991_vm1, %v5057_v55  ;;  %4589 = vmatpush3.bf16.msra.mxu1 %v5073_v41  ;;  %v5588_v28 = vld [vmem:[#allocation2 + $0x10] sm:$0xff]  }
 0x12f   : > { %v774_v62 = vadd.f32 1.0, %v5172_v57  ;;  %v738_v63 = vmul.f32 0.70710677, %v5545_v54  ;;  %v4352_v0 = vadd.f32 %v4351_v59, %v4350_v52  ;;  %v4280_v2 = vpack.c.bf16 %v793_v58, %v793_v58  ;;  %4681 = vmatpush3.bf16.msra.mxu0 %v5457_v44  ;;  %4590 = vmatprep.subr.bf16.mxu1 %v5078_v56 }
 0x130   : > { %v4353_v3 = vpop.f32.mrf.mxu0  ;;  %4682 = vmatprep.subr.bf16.mxu0 %v5061_v50  ;;  %v2349_v42 = vrot.slane %v5588_v28, 1  ;;  %v718_v55 = vmul.f32 0.5, %v5545_v54 }
 0x131   : > { %v794_v4 = vmul.f32 %v774_v62, %v714_v61  ;;  %5179 = verf.f32 %v738_v63  ;;  %v5566_v6 = vadd.f32 %v4352_v0, %v679_v60  ;;  %894 = vst.msk [vmem:[#allocation2 + $0x20] sm:$0xf] %vm885_vm0, %v4280_v2  ;;  %v5616_v60 = vld [vmem:[#allocation2] sm:$0xff]   ;;  %v683_v61 = vld [vmem:[%s6395_s1 + $0x90] sm:$0xff]  ;;  %v684_v63 = vld [vmem:[%s6395_s1 + $0x98] sm:$0xff] }
 0x132   : > { %v4354_v7 = vpop.f32.mrf.mxu0  ;;  %v5174_v44 = vpop.eup %5173  ;;  %4591 = vmatpush3.bf16.msra.mxu1 %v5078_v56  ;;  %v2350_v57 = vsel %vm1510_vm2, %v2348_v48, %v2349_v42 }
 0x133   : > { %v4281_v9 = vpack.c.bf16 %v794_v4, %v794_v4  ;;  %v739_v11 = vmul.f32 0.70710677, %v5566_v6  ;;  %v4355_v12 = vadd.f32 %v4354_v7, %v4353_v3  ;;  %v775_v13 = vadd.f32 1.0, %v5174_v44  ;;  %4683 = vmatpush3.bf16.msra.mxu0 %v5061_v50  ;;  %4608 = vmatprep.subr.bf16.mxu1 %v5564_v5 }
 0x134   : > { %v4356_v14 = vpop.f32.mrf.mxu0  ;;  %v5058_v16 = vld [vmem:[#allocation2 + $0x18] sm:$0xff]   ;;  %4684 = vmatprep.subr.bf16.mxu0 %v5065_v1 }
 0x135   : > { %895 = vst.msk [vmem:[#allocation2 + $0x24] sm:$0xf] %vm885_vm0, %v4281_v9  ;;  %5181 = verf.f32 %v739_v11  ;;  %v5575_v17 = vadd.f32 %v4355_v12, %v680_v8  ;;  %v5059_v18 = vld [vmem:[#allocation2 + $0x18] sm:$0xff]   ;;  %v795_v20 = vmul.f32 %v775_v13, %v715_v10  ;;  %4573 = vmatmul.mubr.msk.bf16.gmra.mxu1 %vm991_vm1, %v5058_v16  ;;  %v5630_v13 = vld [vmem:[#allocation2 + $0x8] sm:$0xff]  }
 0x136   : > { %v5176_v15 = vpop.eup %5175  ;;  %v4357_v21 = vpop.f32.mrf.mxu0  ;;  %4644 = vmatprep.mubr.msk.bf16.mxu0 %vm991_vm1, %v5059_v18  ;;  %v5071_v51 = vld [vmem:[#allocation2 + $0x18] sm:$0xff]  }
 0x137   : > { %v776_v24 = vadd.f32 1.0, %v5176_v15  ;;  %v740_v25 = vmul.f32 0.70710677, %v5575_v17  ;;  %v4358_v27 = vadd.f32 %v4357_v21, %v4356_v14  ;;  %v4282_v30 = vpack.c.bf16 %v795_v20, %v795_v20  ;;  %4685 = vmatpush3.bf16.msra.mxu0 %v5065_v1 }
 0x138   : > { %v4359_v31 = vpop.f32.mrf.mxu0  ;;  %4686 = vmatprep.subr.bf16.mxu0 %v5068_v19  ;;  %v719_v1 = vmul.f32 0.5, %v5566_v6  ;;  %v2351_v2 = vrot.slane %v5071_v51, 1  ;;  %v5086_v6 = vld [vmem:[%s6397_s3 + $0xf0] sm:$0xff]  }
 0x139   : > { %v796_v34 = vmul.f32 %v776_v24, %v716_v23  ;;  %5183 = verf.f32 %v740_v25  ;;  %v5595_v26 = vadd.f32 %v4358_v27, %v681_v22  ;;  %896 = vst.msk [vmem:[#allocation2 + $0x28] sm:$0xf] %vm885_vm0, %v4282_v30  ;;  %v720_v22 = vmul.f32 0.5, %v5575_v17  ;;  %v5089_v25 = vld [vmem:[%s6397_s3 + $0xe8] sm:$0xff]  }
 0x13a   : > { %v5178_v33 = vpop.eup %5177  ;;  %v4360_v36 = vpop.f32.mrf.mxu0  ;;  %v2352_v16 = vsel %vm1510_vm2, %v2349_v42, %v2351_v2  ;;  %v1201_v17 = vshll.u32 %v5630_v13, 16 }
 0x13b   : > { %v4283_v38 = vpack.c.bf16 %v796_v34, %v796_v34  ;;  %v777_v39 = vadd.f32 1.0, %v5178_v33  ;;  %v741_v41 = vmul.f32 0.70710677, %v5595_v26  ;;  %v4361_v43 = vadd.f32 %v4360_v36, %v4359_v31  ;;  %4687 = vmatpush3.bf16.msra.mxu0 %v5068_v19 }
 0x13c   : > { %v5063_v46 = vld [vmem:[#allocation2 + $0x20] sm:$0xff]   ;;  %v4362_v47 = vpop.f32.mrf.mxu0  ;;  %4728 = vmatprep.subr.bf16.mxu0 %v5593_v29  ;;  %v1196_v19 = vshll.u32 %v5616_v60, 16  ;;  %v721_v28 = vmul.f32 0.5, %v5595_v26  ;;  %v1194_v26 = vshrl.u32 %v5616_v60, 16 }
 0x13d   : > { %897 = vst.msk [vmem:[#allocation2 + $0x2c] sm:$0xf] %vm885_vm0, %v4283_v38  ;;  %v797_v45 = vmul.f32 %v777_v39, %v717_v35  ;;  %5185 = verf.f32 %v741_v41  ;;  %v5064_v40 = vld [vmem:[#allocation2 + $0x20] sm:$0xff]   ;;  %v5606_v50 = vadd.f32 %v4361_v43, %v682_v37  ;;  %4576 = vmatprep.mubr.msk.bf16.mxu1 %vm991_vm1, %v5063_v46  ;;  %v5082_v35 = vld [vmem:[#allocation2 + $0x10] sm:$0xff]   ;;  %v1203_v39 = vrot.slane %v1201_v17, 1  ;;  %v5661_v46 = vld [vmem:[#allocation2 + $0x18] sm:$0xff]  }
 0x13e   : > { %v5180_v49 = vpop.eup %5179  ;;  %v4363_v52 = vpop.f32.mrf.mxu0  ;;  %4645 = vmatmul.mubr.msk.bf16.gmra.mxu0 %vm991_vm1, %v5064_v40  ;;  %v5612_v58 = vld [vmem:[#allocation2 + $0x20] sm:$0xff]   ;;  %v1198_v37 = vrot.slane %v1196_v19, 1  ;;  %v1209_v48 = vshll.u32 %v5082_v35, 16 }
 0x13f   : > { %v4284_v53 = vpack.c.bf16 %v797_v45, %v797_v45  ;;  %v778_v56 = vadd.f32 1.0, %v5180_v49  ;;  %v742_v59 = vmul.f32 0.70710677, %v5606_v50  ;;  %4688 = vmatprep.mubr.msk.bf16.mxu0 %vm991_vm1, %v2350_v57  ;;  %v4364_v3 = vadd.f32 %v4363_v52, %v4362_v47  ;;  %v5094_v41 = vld [vmem:[%s6397_s3 + $0xe0] sm:$0xff]  }
 0x140   : > { %v4365_v62 = vpop.f32.mrf.mxu0  ;;  %v2353_v44 = vrot.slane %v5612_v58, 1  ;;  %v722_v42 = vmul.f32 0.5, %v5606_v50  ;;  %v1199_v52 = vor.u32 %v1198_v37, %v1194_v26  ;;  %v1217_v57 = vshll.u32 %v5661_v46, 16 }
 0x141   : > { %898 = vst.msk [vmem:[#allocation2 + $0x30] sm:$0xf] %vm885_vm0, %v4284_v53  ;;  %v798_v54 = vmul.f32 %v778_v56, %v718_v55  ;;  %5187 = verf.f32 %v742_v59  ;;  %v5627_v11 = vadd.f32 %v4364_v3, %v683_v61  ;;  %v5666_v53 = vld [vmem:[#allocation2 + $0x10] sm:$0xff]   ;;  %v1211_v58 = vrot.slane %v1209_v48, 1  ;;  %v5088_v59 = vld [vmem:[#allocation2 + $0x20] sm:$0xff]  }
 0x142   : > { %v5182_v0 = vpop.eup %5181  ;;  %v4366_v4 = vpop.f32.mrf.mxu0  ;;  %v2354_v24 = vsel %vm1510_vm2, %v2351_v2, %v2353_v44  ;;  %v1204_v56 = vsel %vm1192_vm3, %v1199_v52, %v1203_v39  ;;  %v1219_v3 = vrot.slane %v1217_v57, 1  ;;  %v2869_v37 = vshrl.u32 %v5666_v53, 16 }
 0x143   : > { %v4285_v7 = vpack.c.bf16 %v798_v54, %v798_v54  ;;  %v779_v8 = vadd.f32 1.0, %v5182_v0  ;;  %v4367_v9 = vadd.f32 %v4366_v4, %v4365_v62  ;;  %v743_v15 = vmul.f32 0.70710677, %v5627_v11 }
 0x144   : > { %v5070_v10 = vld [vmem:[#allocation2 + $0x28] sm:$0xff]   ;;  %v723_v62 = vmul.f32 0.5, %v5627_v11  ;;  %v1213_v0 = vshrl.u32 %v5082_v35, 16 }
 0x145   : > { %899 = vst.msk [vmem:[#allocation2 + $0x34] sm:$0xf] %vm885_vm0, %v4285_v7  ;;  %v799_v12 = vmul.f32 %v779_v8, %v719_v1  ;;  %4577 = vmatmul.mubr.msk.bf16.gmra.mxu1 %vm991_vm1, %v5070_v10  ;;  %v5075_v18 = vld [vmem:[#allocation2 + $0x28] sm:$0xff]   ;;  %v5639_v20 = vadd.f32 %v4367_v9, %v684_v63  ;;  %5189 = verf.f32 %v743_v15  ;;  %v1205_v63 = vshrl.u32 %v5630_v13, 16  ;;  %v5091_v9 = vld [vmem:[%s6397_s3 + $0x50] sm:$0xff]   ;;  %v5682_v10 = vld [vmem:[#allocation2 + $0x18] sm:$0xff]  }
 0x146   : > { %v5184_v14 = vpop.eup %5183  ;;  %4689 = vmatmul.mubr.msk.bf16.vlgmr.msra.gmra.mxu0 %vm991_vm1, %v2352_v16  ;;  %v2355_v31 = vrot.slane %v5075_v18, 1  ;;  %v2871_v1 = vshll.u32 %v5666_v53, 16  ;;  %v5677_v4 = vld [vmem:[#allocation2 + $0x28] sm:$0xff]   ;;  %v1221_v18 = vshrl.u32 %v5661_v46, 16  ;;  %v5101_v46 = vld [vmem:[%s6397_s3 + $0x40] sm:$0xff]   ;;  %v2880_v48 = vshrl.u32 %v5682_v10, 16 }
 0x147   : > { %v4286_v21 = vpack.c.bf16 %v799_v12, %v799_v12  ;;  %v780_v23 = vadd.f32 1.0, %v5184_v14  ;;  %4692 = vmatprep.mubr.msk.bf16.mxu0 %vm991_vm1, %v2354_v24  ;;  %4729 = vmatpush3.bf16.msra.mxu0 %v5593_v29  ;;  %v744_v32 = vmul.f32 0.70710677, %v5639_v20  ;;  %v1207_v8 = vor.u32 %v1205_v63, %v1203_v39 }
 0x148   : > { %4730 = vmatprep.subr.bf16.mxu0 %v5086_v6  ;;  %v2356_v43 = vsel %vm1510_vm2, %v2353_v44, %v2355_v31  ;;  %v1215_v44 = vor.u32 %v1213_v0, %v1211_v58  ;;  %v1225_v12 = vshll.u32 %v5088_v59, 16  ;;  %v2873_v19 = vrot.slane %v2871_v1, 1 }
 0x149   : > { %900 = vst.msk [vmem:[#allocation2 + $0x38] sm:$0xf] %vm885_vm0, %v4286_v21  ;;  %v800_v27 = vmul.f32 %v780_v23, %v720_v22  ;;  %5191 = verf.f32 %v744_v32  ;;  %v1212_v16 = vsel %vm1192_vm3, %v1207_v8, %v1211_v58  ;;  %v1233_v21 = vshll.u32 %v5677_v4, 16 }
 0x14a   : > { %v5186_v30 = vpop.eup %5185  ;;  %v1220_v15 = vsel %vm1192_vm3, %v1215_v44, %v1219_v3  ;;  %v2876_v24 = vshll.u32 %v5682_v10, 16  ;;  %v5102_v10 = vld [vmem:[#allocation2] sm:$0xfe]  }
 0x14b   : > { %v4287_v34 = vpack.c.bf16 %v800_v27, %v800_v27  ;;  %v781_v33 = vadd.f32 1.0, %v5186_v30  ;;  %4731 = vmatpush3.bf16.msra.mxu0 %v5086_v6  ;;  %v724_v6 = vmul.f32 0.5, %v5639_v20  ;;  %v5098_v20 = vld [vmem:[%s6397_s3 + $0x48] sm:$0xff]   ;;  %v1227_v27 = vrot.slane %v1225_v12, 1 }
 0x14c   : > { %v5074_v36 = vld [vmem:[#allocation2 + $0x30] sm:$0xff]   ;;  %4732 = vmatprep.subr.bf16.mxu0 %v5089_v25  ;;  %v1235_v32 = vrot.slane %v1233_v21, 1  ;;  %v1511_v21 = vrot.slane %v5102_v10, 1  ;;  %v5122_v10 = vld [vmem:[%s6397_s3 + $0x80] sm:$0xff]  }
 0x14d   : > { %901 = vst.msk [vmem:[#allocation2 + $0x3c] sm:$0xf] %vm885_vm0, %v4287_v34  ;;  %v801_v29 = vmul.f32 %v781_v33, %v721_v28  ;;  %v5076_v38 = vld [vmem:[#allocation2 + $0x30] sm:$0xff]   ;;  %4580 = vmatprep.mubr.msk.bf16.mxu1 %vm991_vm1, %v5074_v36  ;;  %v1223_v36 = vor.u32 %v1221_v18, %v1219_v3 }
 0x14e   : > { %v5188_v47 = vpop.eup %5187  ;;  %4693 = vmatmul.mubr.msk.bf16.gmra.mxu0 %vm991_vm1, %v2356_v43  ;;  %v2357_v40 = vrot.slane %v5076_v38, 1  ;;  %v5095_v28 = vld [vmem:[#allocation2 + $0x30] sm:$0xff]   ;;  %v2874_v43 = vor.u32 %v2873_v19, %v2869_v37 }
 0x14f   : > { %v4288_v45 = vpack.c.bf16 %v801_v29, %v801_v29  ;;  %v782_v49 = vadd.f32 1.0, %v5188_v47  ;;  %4733 = vmatpush3.bf16.msra.mxu0 %v5089_v25  ;;  %v5096_v25 = vld [vmem:[#allocation2 + $0x20] sm:$0xff]   ;;  %v5099_v29 = vld [vmem:[#allocation2 + $0x28] sm:$0xff]   ;;  %v1241_v26 = vshll.u32 %v5095_v28, 16  ;;  %v5100_v53 = vld [vmem:[#allocation2 + $0x30] sm:$0xff]  }
 0x150   : > { %v5077_v51 = vld [vmem:[#allocation2 + $0x38] ss:$0 sps:$4 sm:$0xff]   ;;  %v2358_v50 = vsel %vm1510_vm2, %v2355_v31, %v2357_v40  ;;  %4734 = vmatprep.subr.bf16.mxu0 %v5094_v41  ;;  %v1229_v31 = vshrl.u32 %v5088_v59, 16  ;;  %v2884_v39 = vshll.u32 %v5096_v25, 16  ;;  %v2888_v58 = vshrl.u32 %v5096_v25, 16 }
 0x151   : > { %902 = vst.msk [vmem:[#allocation2 + $0x40] sm:$0xf] %vm885_vm0, %v4288_v45  ;;  %v802_v55 = vmul.f32 %v782_v49, %v722_v42  ;;  %4696 = vmatprep.mubr.msk.bf16.mxu0 %vm991_vm1, %v2358_v50  ;;  %4581 = vmatmul.mubr.msk.bf16.gmra.mxu1 %vm991_vm1, %v5077_v51  ;;  %v1228_v42 = vsel %vm1192_vm3, %v1223_v36, %v1227_v27  ;;  %v2892_v49 = vshll.u32 %v5099_v29, 16  ;;  %v1243_v51 = vrot.slane %v1241_v26, 1 }
 0x152   : > { %4592 = vmatprep.mubr.msk.bf16.mxu1 %vm991_vm1, %v1204_v56  ;;  %v5190_v54 = vpop.eup %5189  ;;  %v1231_v38 = vor.u32 %v1229_v31, %v1227_v27  ;;  %v2886_v52 = vrot.slane %v2884_v39, 1  ;;  %v1237_v50 = vshrl.u32 %v5677_v4, 16  ;;  %v2900_v1 = vshll.u32 %v5100_v53, 16  ;;  %v5109_v39 = vld [vmem:[#allocation2 + $0x28] sm:$0xff]  }
 0x153   : > { %v4289_v60 = vpack.c.bf16 %v802_v55, %v802_v55  ;;  %4735 = vmatpush3.bf16.msra.mxu0 %v5094_v41  ;;  %v783_v7 = vadd.f32 1.0, %v5190_v54  ;;  %v1245_v55 = vshrl.u32 %v5095_v28, 16  ;;  %v2894_v59 = vrot.slane %v2892_v49, 1  ;;  %v5103_v54 = vld [vmem:[#allocation2 + $0x8] sm:$0xff]   ;;  %v5107_v28 = vld [vmem:[#allocation2 + $0x18] sm:$0xff]  }
 0x154   : > { %v5081_v61 = vld [vmem:[#allocation2 + $0x38] sm:$0xff]   ;;  %v1236_v47 = vsel %vm1192_vm3, %v1231_v38, %v1235_v32  ;;  %v1239_v57 = vor.u32 %v1237_v50, %v1235_v32  ;;  %v2890_v0 = vor.u32 %v2888_v58, %v2886_v52  ;;  %v5196_v50 = vld [vmem:[%s6397_s3 + $0x60] sm:$0xff]   ;;  %v5112_v58 = vld [vmem:[#allocation2 + $0x28] sm:$0xff]  }
 0x155   : > { %903 = vst.msk [vmem:[#allocation2 + $0x44] sm:$0xf] %vm885_vm0, %v4289_v60  ;;  %v2359_v2 = vrot.slane %v5081_v61, 1  ;;  %v803_v13 = vmul.f32 %v783_v7, %v723_v62  ;;  %v5699_v33 = vld [vmem:[#allocation2 + $0x38] sm:$0x1f]   ;;  %v1247_v62 = vor.u32 %v1245_v55, %v1243_v51 }
 0x156   : > { %v5192_v14 = vpop.eup %5191  ;;  %v1249_v45 = vshll.u32 %v5699_v33, 16  ;;  %v5104_v60 = vld [vmem:[#allocation2 + $0x38] sm:$0xff]   ;;  %v1244_v63 = vsel %vm1192_vm3, %v1239_v57, %v1243_v51  ;;  %v2895_v7 = vsel %vm1192_vm3, %v2890_v0, %v2894_v59  ;;  %v1253_v12 = vshrl.u32 %v5699_v33, 16 }
 0x157   : > { %v2360_v11 = vsel %vm1510_vm2, %v2357_v40, %v2359_v2  ;;  %v4290_v22 = vpack.c.bf16 %v803_v13, %v803_v13  ;;  %v784_v23 = vadd.f32 1.0, %v5192_v14  ;;  %v2908_v8 = vshll.u32 %v5104_v60, 16  ;;  %v5111_v51 = vld [vmem:[#allocation2 + $0x38] sm:$0x1f]  }
 0x158   : > { %4697 = vmatmul.mubr.msk.bf16.gmra.mxu0 %vm991_vm1, %v2360_v11  ;;  %v1251_v56 = vrot.slane %v1249_v45, 1  ;;  %v1512_v11 = vrot.slane %v5103_v54, 1  ;;  %v2902_v13 = vrot.slane %v2900_v1, 1  ;;  %v2904_v14 = vshrl.u32 %v5100_v53, 16  ;;  %v5115_v53 = vld [vmem:[%s6397_s3 + $0x98] sm:$0xff]   ;;  %v5119_v1 = vld [vmem:[%s6397_s3 + $0x88] sm:$0xff]  }
 0x159   : > { %4593 = vmatmul.mubr.msk.bf16.vlgmr.msra.gmra.mxu1 %vm991_vm1, %v1212_v16  ;;  %904 = vst.msk [vmem:[#allocation2 + $0x48] sm:$0xf] %vm885_vm0, %v4290_v22  ;;  %v804_v17 = vmul.f32 %v784_v23, %v724_v6  ;;  %v2910_v16 = vrot.slane %v2908_v8, 1  ;;  %v5105_v22 = vld [vmem:[#allocation2 + $0x10] sm:$0xff]   ;;  %v2912_v33 = vshrl.u32 %v5104_v60, 16  ;;  %v1524_v55 = vrot.slane %v5111_v51, 1 }
 0x15a   : > { %4596 = vmatprep.mubr.msk.bf16.mxu1 %vm991_vm1, %v1220_v15  ;;  %4609 = vmatpush3.bf16.msra.mxu1 %v5564_v5  ;;  %v2878_v5 = vrot.slane %v2876_v24, 1  ;;  %v1252_v4 = vsel %vm1192_vm3, %v1247_v62, %v1251_v56  ;;  %v1255_v19 = vor.u32 %v1253_v12, %v1251_v56  ;;  %v2906_v23 = vor.u32 %v2904_v14, %v2902_v13  ;;  %v5121_v60 = vld [vmem:[#allocation2 + $0x10] sm:$0xff]   ;;  %v5124_v8 = vld [vmem:[#allocation2 + $0x20] sm:$0xff]   ;;  %v5125_v14 = vld [vmem:[%s6397_s3 + $0xd8] sm:$0xff]  }
 0x15b   : > { %4610 = vmatprep.subr.bf16.mxu1 %v5091_v9  ;;  %v4291_v34 = vpack.c.bf16 %v804_v17, %v804_v17  ;;  %v1513_v27 = vsel %vm1510_vm2, %v1511_v21, %v1512_v11  ;;  %v1514_v31 = vrot.slane %v5105_v22, 1  ;;  %v2914_v36 = vor.u32 %v2912_v33, %v2910_v16  ;;  %v5117_v62 = vld [vmem:[%s6397_s3 + $0x90] sm:$0xff]  }
 0x15c   : > { %v5087_v30 = vld [vmem:[#allocation2 + $0x40] sm:$0x1f]   ;;  %v2879_v40 = vsel %vm1192_vm3, %v2874_v43, %v2878_v5  ;;  %v2882_v61 = vor.u32 %v2880_v48, %v2878_v5  ;;  %v2911_v17 = vsel %vm1192_vm3, %v2906_v23, %v2910_v16  ;;  %v5194_v43 = vld [vmem:[%s6397_s3 + $0x70] sm:$0xff]   ;;  %v5195_v48 = vld [vmem:[%s6397_s3 + $0x68] sm:$0xff]   ;;  %v2039_v0 = vshll.u32 %v5121_v60, 16 }
 0x15d   : > { %v2361_v35 = vrot.slane %v5087_v30, 1  ;;  %905 = vst.msk [vmem:[#allocation2 + $0x4c] sm:$0xf] %vm885_vm0, %v4291_v34  ;;  %v5106_v44 = vld [vmem:[#allocation2 + $0x40] sm:$0xff]   ;;  %v1515_v37 = vsel %vm1510_vm2, %v1512_v11, %v1514_v31  ;;  %v5126_v16 = vld [vmem:[#allocation2 + $0x28] sm:$0xff]   ;;  %v5127_v21 = vld [vmem:[#allocation2 + $0x30] sm:$0xff]  }
 0x15e   : > { %4611 = vmatpush3.bf16.msra.mxu1 %v5091_v9  ;;  %v2887_v3 = vsel %vm1192_vm3, %v2882_v61, %v2886_v52  ;;  %v2896_v9 = vshrl.u32 %v5099_v29, 16  ;;  %v2916_v18 = vshll.u32 %v5106_v44, 16  ;;  %v5108_v5 = vld [vmem:[#allocation2 + $0x20] sm:$0xff]   ;;  %v5114_v61 = vld [vmem:[#allocation2 + $0x30] sm:$0xff]  }
 0x15f   : > { %4612 = vmatprep.subr.bf16.mxu1 %v5098_v20  ;;  %v2362_v41 = vsel %vm1510_vm2, %v2359_v2, %v2361_v35  ;;  %v5193_v2 = vld [vmem:[%s6397_s3 + $0x78] sm:$0xff]  }
 0x160   : > { %4700 = vmatprep.mubr.msk.bf16.mxu0 %vm991_vm1, %v2362_v41  ;;  %v2898_v15 = vor.u32 %v2896_v9, %v2894_v59  ;;  %v2918_v30 = vrot.slane %v2916_v18, 1  ;;  %v5120_v59 = vld [vmem:[#allocation2 + $0x8] sm:$0xff]   ;;  %v2043_v18 = vshrl.u32 %v5121_v60, 16  ;;  %v5138_v60 = vld [vmem:[#allocation2 + $0x30] sm:$0xff]  }
 0x161   : > { %4597 = vmatmul.mubr.msk.bf16.gmra.mxu1 %vm991_vm1, %v1228_v42  ;;  %4701 = vmatmul.mubr.msk.bf16.gmra.mxu0 %vm991_vm1, %v2361_v35  ;;  %v1516_v35 = vrot.slane %v5107_v28, 1  ;;  %v1518_v42 = vrot.slane %v5108_v5, 1  ;;  %v2034_v54 = vshll.u32 %v5120_v59, 16  ;;  %v2071_v28 = vshll.u32 %v5127_v21, 16 }
 0x162   : > { %4600 = vmatprep.mubr.msk.bf16.mxu1 %vm991_vm1, %v1236_v47  ;;  %4736 = vmatprep.mubr.msk.bf16.mxu0 %vm991_vm1, %v2879_v40  ;;  %v2903_v25 = vsel %vm1192_vm3, %v2898_v15, %v2902_v13  ;;  %v2919_v38 = vsel %vm1192_vm3, %v2914_v36, %v2918_v30  ;;  %v5110_v40 = vld [vmem:[#allocation2 + $0x30] sm:$0xff]   ;;  %v2055_v13 = vshll.u32 %v5124_v8, 16 }
 0x163   : > { %4613 = vmatpush3.bf16.msra.mxu1 %v5098_v20  ;;  %v2920_v20 = vshrl.u32 %v5106_v44, 16  ;;  %v1517_v26 = vsel %vm1510_vm2, %v1514_v31, %v1516_v35  ;;  %v1519_v45 = vsel %vm1510_vm2, %v1516_v35, %v1518_v42  ;;  %v1522_v52 = vrot.slane %v5110_v40, 1  ;;  %v5118_v44 = vld [vmem:[#allocation2 + $0x40] ss:$0 sps:$4 sm:$0xff]   ;;  %v5131_v31 = vld [vmem:[%s6397_s3 + $0xc8] sm:$0xff]  }
 0x164   : > { %4614 = vmatprep.subr.bf16.mxu1 %v5101_v46  ;;  %v5113_v6 = vld [vmem:[#allocation2 + $0x48] sm:$0x1f]   ;;  %v2057_v15 = vrot.slane %v2055_v13, 1  ;;  %v2073_v33 = vrot.slane %v2071_v28, 1  ;;  %v5130_v35 = vld [vmem:[#allocation2 + $0x40] sm:$0x1f]  }
 0x165   : > { %v2924_v24 = vshll.u32 %v5113_v6, 16  ;;  %v2922_v32 = vor.u32 %v2920_v20, %v2918_v30  ;;  %v2928_v41 = vshrl.u32 %v5113_v6, 16  ;;  %v1525_v57 = vsel %vm1510_vm2, %v1522_v52, %v1524_v55  ;;  %v5129_v30 = vld [vmem:[#allocation2 + $0x38] sm:$0xff]  }
 0x166   : > { %v2063_v20 = vshll.u32 %v5126_v16, 16  ;;  %v2079_v5 = vshll.u32 %v5129_v30, 16  ;;  %v2091_v51 = vshrl.u32 %v5130_v35, 16  ;;  %v5150_v13 = vld [vmem:[#allocation2 + $0x38] sm:$0xff]  }
 0x167   : > { %4615 = vmatpush3.bf16.msra.mxu1 %v5101_v46  ;;  %v2926_v34 = vrot.slane %v2924_v24, 1  ;;  %v1520_v46 = vrot.slane %v5109_v39, 1  ;;  %v5128_v24 = vld [vmem:[%s6397_s3 + $0xd0] sm:$0xff]   ;;  %v2087_v39 = vshll.u32 %v5130_v35, 16 }
 0x168   : > { %4949 = vmatprep.subr.bf16.mxu1 %v5193_v2 }
 0x169   : > { %4601 = vmatmul.mubr.msk.bf16.gmra.mxu1 %vm991_vm1, %v1244_v63  ;;  %4737 = vmatmul.mubr.msk.bf16.vlgmr.msra.gmra.mxu0 %vm991_vm1, %v2887_v3  ;;  %v2927_v29 = vsel %vm1192_vm3, %v2922_v32, %v2926_v34  ;;  %v2930_v47 = vor.u32 %v2928_v41, %v2926_v34  ;;  %v1521_v49 = vsel %vm1510_vm2, %v1518_v42, %v1520_v46  ;;  %v5116_v63 = vld [vmem:[#allocation2 + $0x38] sm:$0xff]   ;;  %v2059_v32 = vshrl.u32 %v5124_v8, 16 }
 0x16a   : > { %4604 = vmatprep.mubr.msk.bf16.mxu1 %vm991_vm1, %v1252_v4  ;;  %4740 = vmatprep.mubr.msk.bf16.mxu0 %vm991_vm1, %v2895_v7  ;;  %v1523_v56 = vsel %vm1510_vm2, %v1520_v46, %v1522_v52  ;;  %v5123_v3 = vld [vmem:[#allocation2 + $0x18] sm:$0xff]   ;;  %v2032_v4 = vshrl.u32 %v5120_v59, 16  ;;  %v2041_v7 = vrot.slane %v2039_v0, 1  ;;  %v2067_v34 = vshrl.u32 %v5126_v16, 16  ;;  %v5144_v59 = vld [vmem:[%s6397_s3 + $0x100] sm:$0xff]  }
 0x16b   : > { %v2047_v11 = vshll.u32 %v5123_v3, 16  ;;  %v2061_v36 = vor.u32 %v2059_v32, %v2057_v15  ;;  %v2081_v41 = vrot.slane %v2079_v5, 1  ;;  %v5136_v42 = vld [vmem:[%s6397_s3 + $0x118] sm:$0xff]   ;;  %v2083_v46 = vshrl.u32 %v5129_v30, 16 }
 0x16c   : > { %v2045_v22 = vor.u32 %v2043_v18, %v2041_v7  ;;  %v3194_v16 = vrot.slane %v5150_v13, 1 }
 0x16d   : > { %v2049_v6 = vrot.slane %v2047_v11, 1  ;;  %v2085_v40 = vor.u32 %v2083_v46, %v2081_v41 }
 0x171   : > { %4605 = vmatmul.mubr.msk.bf16.gmra.mxu1 %vm991_vm1, %v1255_v19  ;;  %4741 = vmatmul.mubr.msk.bf16.gmra.mxu0 %vm991_vm1, %v2903_v25  ;;  %v2051_v19 = vshrl.u32 %v5123_v3, 16  ;;  %v2050_v25 = vsel %vm1192_vm3, %v2045_v22, %v2049_v6  ;;  %v5147_v3 = vld [vmem:[#allocation2 + $0x20] sm:$0xff]  }
 0x172   : > { %4616 = vmatprep.mubr.msk.bf16.mxu1 %vm991_vm1, %v1513_v27  ;;  %4744 = vmatprep.mubr.msk.bf16.mxu0 %vm991_vm1, %v2911_v17  ;;  %v2065_v17 = vrot.slane %v2063_v20, 1  ;;  %v3188_v8 = vrot.slane %v5147_v3, 1 }
 0x173   : > { %v2053_v23 = vor.u32 %v2051_v19, %v2049_v6 }
 0x175   : > { %v2058_v27 = vsel %vm1192_vm3, %v2053_v23, %v2057_v15  ;;  %v5151_v15 = vld [vmem:[#allocation2 + $0x40] sm:$0xff]   ;;  %v5152_v23 = vld [vmem:[#allocation2 + $0x48] sm:$0x1f]  }
 0x179   : > { %4617 = vmatmul.mubr.msk.bf16.vlgmr.msra.gmra.mxu1 %vm991_vm1, %v1515_v37  ;;  %4745 = vmatmul.mubr.msk.bf16.gmra.mxu0 %vm991_vm1, %v2919_v38  ;;  %v2069_v37 = vor.u32 %v2067_v34, %v2065_v17  ;;  %v2066_v38 = vsel %vm1192_vm3, %v2061_v36, %v2065_v17 }
 0x17a   : > { %4620 = vmatprep.mubr.msk.bf16.mxu1 %vm991_vm1, %v1517_v26  ;;  %4953 = vmatpush3.bf16.msra.mxu1 %v5193_v2  ;;  %v2036_v2 = vrot.slane %v2034_v54, 1  ;;  %v5146_v54 = vld [vmem:[#allocation2 + $0x18] sm:$0xff]  }
 0x17b   : > { %4748 = vmatprep.mubr.msk.bf16.mxu0 %vm991_vm1, %v2927_v29  ;;  %4950 = vmatprep.subr.bf16.mxu1 %v5194_v43  ;;  %v5132_v29 = vld [vmem:[%s6397_s3 + $0xc0] sm:$0xff]   ;;  %v2074_v26 = vsel %vm1192_vm3, %v2069_v37, %v2073_v33  ;;  %v3186_v0 = vrot.slane %v5146_v54, 1 }
 0x17c   : > { %v2037_v9 = vor.u32 %v2036_v2, %v2032_v4 }
 0x17e   : > { %4954 = vmatpush3.bf16.msra.mxu1 %v5194_v43  ;;  %v2042_v12 = vsel %vm1192_vm3, %v2037_v9, %v2041_v7  ;;  %v2075_v43 = vshrl.u32 %v5127_v21, 16  ;;  %v5148_v7 = vld [vmem:[#allocation2 + $0x28] sm:$0xff]   ;;  %v3189_v9 = vsel %vm1510_vm2, %v3186_v0, %v3188_v8 }
 0x17f   : > { %4951 = vmatprep.subr.bf16.mxu1 %v5195_v48 }
 0x181   : > { %4621 = vmatmul.mubr.msk.bf16.gmra.mxu1 %vm991_vm1, %v1519_v45  ;;  %4749 = vmatmul.mubr.msk.bf16.gmra.mxu0 %vm991_vm1, %v2930_v47  ;;  %v2089_v47 = vrot.slane %v2087_v39, 1  ;;  %v2077_v45 = vor.u32 %v2075_v43, %v2073_v33 }
 0x182   : > { %4624 = vmatprep.mubr.msk.bf16.mxu1 %vm991_vm1, %v1521_v49  ;;  %4955 = vmatpush3.bf16.msra.mxu1 %v5195_v48 }
 0x183   : > { %4952 = vmatprep.subr.bf16.mxu1 %v5196_v50  ;;  %v2082_v48 = vsel %vm1192_vm3, %v2077_v45, %v2081_v41  ;;  %v2090_v49 = vsel %vm1192_vm3, %v2085_v40, %v2089_v47  ;;  %v2093_v52 = vor.u32 %v2091_v51, %v2089_v47 }
 0x186   : > { %4956 = vmatpush3.bf16.msra.mxu1 %v5196_v50  ;;  %v5133_v50 = vld [vmem:[#allocation2 + $0x10] sm:$0xff]  }
 0x187   : > { %4656 = vmatprep.subr.bf16.mxu1 %v5115_v53 }
 0x189   : > { %4625 = vmatmul.mubr.msk.bf16.gmra.mxu1 %vm991_vm1, %v1523_v56  ;;  %v5135_v56 = vld [vmem:[#allocation2 + $0x20] sm:$0xff]  }
 0x18a   : > { %4628 = vmatprep.mubr.msk.bf16.mxu1 %vm991_vm1, %v1525_v57  ;;  %v5142_v57 = vld [vmem:[%s6397_s3 + $0x108] sm:$0xff]  }
 0x191   : > { %4629 = vmatmul.mubr.msk.bf16.gmra.mxu1 %vm991_vm1, %v1524_v55  ;;  %v5139_v55 = vld [vmem:[%s6397_s3 + $0x110] sm:$0xff]  }
 0x192   : > { %4648 = vmatprep.mubr.msk.bf16.mxu1 %vm991_vm1, %v5112_v58  ;;  %v5137_v58 = vld [vmem:[#allocation2 + $0x28] sm:$0xff]  }
 0x199   : > { %4649 = vmatmul.mubr.msk.bf16.vlgmr.msra.gmra.mxu1 %vm991_vm1, %v5114_v61  ;;  %v5140_v61 = vld [vmem:[#allocation2 + $0x38] sm:$0xff]  }
 0x19a   : > { %4652 = vmatprep.mubr.msk.bf16.mxu1 %vm991_vm1, %v5116_v63  ;;  %4657 = vmatpush3.bf16.msra.mxu1 %v5115_v53  ;;  %v5134_v53 = vld [vmem:[#allocation2 + $0x18] sm:$0xff]   ;;  %v5145_v63 = vld [vmem:[#allocation2 + $0x10] sm:$0xfe]  }
 0x19b   : > { %4658 = vmatprep.subr.bf16.mxu1 %v5117_v62  ;;  %v3185_v2 = vrot.slane %v5145_v63, 1 }
 0x19d   : > { %v3187_v4 = vsel %vm1510_vm2, %v3185_v2, %v3186_v0 }
 0x19e   : > { %4659 = vmatpush3.bf16.msra.mxu1 %v5117_v62  ;;  %v5141_v62 = vld [vmem:[#allocation2 + $0x40] sm:$0xff]  }
 0x19f   : > { %4660 = vmatprep.subr.bf16.mxu1 %v5119_v1 }
 0x1a1   : > { %4653 = vmatmul.mubr.msk.bf16.gmra.mxu1 %vm991_vm1, %v5118_v44  ;;  %v3190_v44 = vrot.slane %v5148_v7, 1 }
 0x1a2   : > { %4661 = vmatpush3.bf16.msra.mxu1 %v5119_v1  ;;  %4664 = vmatprep.mubr.msk.bf16.mxu1 %vm991_vm1, %v2042_v12  ;;  %v5143_v1 = vld [vmem:[#allocation2 + $0x48] ss:$0 sps:$4 sm:$0xff]  }
 0x1a3   : > { %4662 = vmatprep.subr.bf16.mxu1 %v5122_v10  ;;  %v3191_v12 = vsel %vm1510_vm2, %v3188_v8, %v3190_v44 }
 0x1a6   : > { %4663 = vmatpush3.bf16.msra.mxu1 %v5122_v10  ;;  %v5149_v10 = vld [vmem:[#allocation2 + $0x30] sm:$0xff]  }
 0x1a7   : > { %4704 = vmatprep.subr.bf16.mxu1 %v5125_v14  ;;  %v3192_v6 = vrot.slane %v5149_v10, 1 }
 0x1a9   : > { %4665 = vmatmul.mubr.msk.bf16.vlgmr.msra.gmra.mxu1 %vm991_vm1, %v2050_v25  ;;  %v3193_v19 = vsel %vm1510_vm2, %v3190_v44, %v3192_v6  ;;  %v3195_v22 = vsel %vm1510_vm2, %v3192_v6, %v3194_v16 }
 0x1aa   : > { %4668 = vmatprep.mubr.msk.bf16.mxu1 %vm991_vm1, %v2058_v27  ;;  %4705 = vmatpush3.bf16.msra.mxu1 %v5125_v14  ;;  %v3198_v27 = vrot.slane %v5152_v23, 1 }
 0x1ab   : > { %4706 = vmatprep.subr.bf16.mxu1 %v5128_v24 }
 0x1ae   : > { %4707 = vmatpush3.bf16.msra.mxu1 %v5128_v24  ;;  %v3196_v24 = vrot.slane %v5151_v15, 1 }
 0x1af   : > { %4708 = vmatprep.subr.bf16.mxu1 %v5131_v31 }
 0x1b0   : > { %v3197_v30 = vsel %vm1510_vm2, %v3194_v16, %v3196_v24 }
 0x1b1   : > { %4669 = vmatmul.mubr.msk.bf16.gmra.mxu1 %vm991_vm1, %v2066_v38 }
 0x1b2   : > { %4672 = vmatprep.mubr.msk.bf16.mxu1 %vm991_vm1, %v2074_v26  ;;  %4709 = vmatpush3.bf16.msra.mxu1 %v5131_v31  ;;  %v3199_v31 = vsel %vm1510_vm2, %v3196_v24, %v3198_v27 }
 0x1b3   : > { %4710 = vmatprep.subr.bf16.mxu1 %v5132_v29 }
 0x1b6   : > { %4711 = vmatpush3.bf16.msra.mxu1 %v5132_v29 }
 0x1b7   : > { %4752 = vmatprep.subr.bf16.mxu1 %v5136_v42 }
 0x1b9   : > { %4673 = vmatmul.mubr.msk.bf16.gmra.mxu1 %vm991_vm1, %v2082_v48 }
 0x1ba   : > { %4676 = vmatprep.mubr.msk.bf16.mxu1 %vm991_vm1, %v2090_v49 }
 0x1c1   : > { %4677 = vmatmul.mubr.msk.bf16.gmra.mxu1 %vm991_vm1, %v2093_v52 }
 0x1c2   : > { %4712 = vmatprep.mubr.msk.bf16.mxu1 %vm991_vm1, %v5133_v50 }
 0x1c9   : > { %4713 = vmatmul.mubr.msk.bf16.vlgmr.msra.gmra.mxu1 %vm991_vm1, %v5134_v53 }
 0x1ca   : > { %4716 = vmatprep.mubr.msk.bf16.mxu1 %vm991_vm1, %v5135_v56  ;;  %4753 = vmatpush3.bf16.msra.mxu1 %v5136_v42 }
 0x1cb   : > { %4754 = vmatprep.subr.bf16.mxu1 %v5139_v55 }
 0x1ce   : > { %4755 = vmatpush3.bf16.msra.mxu1 %v5139_v55 }
 0x1cf   : > { %4756 = vmatprep.subr.bf16.mxu1 %v5142_v57 }
 0x1d1   : > { %4717 = vmatmul.mubr.msk.bf16.gmra.mxu1 %vm991_vm1, %v5137_v58 }
 0x1d2   : > { %4720 = vmatprep.mubr.msk.bf16.mxu1 %vm991_vm1, %v5138_v60  ;;  %4757 = vmatpush3.bf16.msra.mxu1 %v5142_v57 }
 0x1d3   : > { %4758 = vmatprep.subr.bf16.mxu1 %v5144_v59 }
 0x1d6   : > { %4759 = vmatpush3.bf16.msra.mxu1 %v5144_v59 }
 0x1d9   : > { %4721 = vmatmul.mubr.msk.bf16.gmra.mxu1 %vm991_vm1, %v5140_v61 }
 0x1da   : > { %4724 = vmatprep.mubr.msk.bf16.mxu1 %vm991_vm1, %v5141_v62 }
 0x1e1   : > { %4725 = vmatmul.mubr.msk.bf16.gmra.mxu1 %vm991_vm1, %v5143_v1 }
 0x1e2   : > { %4760 = vmatprep.mubr.msk.bf16.mxu1 %vm991_vm1, %v3187_v4 }
 0x1e5   : > { %v4570_v11 = vpop.f32.mrf.mxu1 }
 0x1e7   : > { %v1050_v14 = vpop.f32.mrf.mxu1 }
 0x1e9   : > { %4761 = vmatmul.mubr.msk.bf16.vlgmr.msra.gmra.mxu1 %vm991_vm1, %v3189_v9  ;;  %v4571_v21 = vpop.f32.mrf.mxu1 }
 0x1ea   : > { %4764 = vmatprep.mubr.msk.bf16.mxu1 %vm991_vm1, %v3191_v12 }
 0x1eb   : > { %v1053_v25 = vpop.f32.mrf.mxu1 }
 0x1ee   : > { %v5833_v18 = vpop.f32.mrf.mxu0 }
 0x1f0   : > { %v5839_v20 = vpop.f32.mrf.mxu0 }
 0x1f1   : > { %4765 = vmatmul.mubr.msk.bf16.gmra.mxu1 %vm991_vm1, %v3193_v19 }
 0x1f2   : > { %4768 = vmatprep.mubr.msk.bf16.mxu1 %vm991_vm1, %v3195_v22  ;;  %v5841_v17 = vpop.f32.mrf.mxu0 }
 0x1f4   : > { %v5847_v34 = vpop.f32.mrf.mxu0 }
 0x1f5   : > { %v4574_v28 = vpop.f32.mrf.mxu1 }
 0x1f7   : > { %v1066_v32 = vpop.f32.mrf.mxu1 }
 0x1f9   : > { %4769 = vmatmul.mubr.msk.bf16.gmra.mxu1 %vm991_vm1, %v3197_v30  ;;  %v4575_v35 = vpop.f32.mrf.mxu1 }
 0x1fa   : > { %4772 = vmatprep.mubr.msk.bf16.mxu1 %vm991_vm1, %v3199_v31 }
 0x1fb   : > { %v1069_v5 = vpop.f32.mrf.mxu1 }
 0x1fe   : > { %v5849_v33 = vpop.f32.mrf.mxu0 }
 0x200   : > { %v5851_v36 = vpop.f32.mrf.mxu0 }
 0x201   : > { %4773 = vmatmul.mubr.msk.bf16.gmra.mxu1 %vm991_vm1, %v3198_v27 }
 0x202   : > { %v5854_v37 = vpop.f32.mrf.mxu0 }
 0x204   : > { %v5856_v29 = vpop.f32.mrf.mxu0 }
 0x205   : > { %v4578_v38 = vpop.f32.mrf.mxu1 }
 0x206   : > { %v5858_v26 = vpop.f32.mrf.mxu0 }
 0x207   : > { %v1082_v39 = vpop.f32.mrf.mxu1 }
 0x208   : > { %v5860_v41 = vpop.f32.mrf.mxu0 }
 0x209   : > { %v4579_v43 = vpop.f32.mrf.mxu1 }
 0x20a   : > { %v5862_v42 = vpop.f32.mrf.mxu0 }
 0x20b   : > { %v1085_v45 = vpop.f32.mrf.mxu1 }
 0x20c   : > { %v5864_v46 = vpop.f32.mrf.mxu0 }
 0x20e   : > { %v5866_v47 = vpop.f32.mrf.mxu0 }
 0x210   : > { %v5868_v40 = vpop.f32.mrf.mxu0 }
 0x211   : > { %v4582_v48 = vpop.f32.mrf.mxu1 }
 0x212   : > { %v5870_v49 = vpop.f32.mrf.mxu0 }
 0x213   : > { %v1098_v51 = vpop.f32.mrf.mxu1 }
 0x214   : > { %v5872_v50 = vpop.f32.mrf.mxu0 }
 0x215   : > { %v4583_v52 = vpop.f32.mrf.mxu1 }
 0x217   : > { %v1101_v53 = vpop.f32.mrf.mxu1 }
 0x218   : > { %v5874_v55 = vpop.f32.mrf.mxu0 }
 0x219   : > { %v4594_v56 = vpop.f32.mrf.mxu1 }
 0x21a   : > { %v1417_v57 = vadd.f32 %v4594_v56, %v4570_v11  ;;  %v5876_v58 = vpop.f32.mrf.mxu0 }
 0x21b   : > { %v1338_v59 = vpop.f32.mrf.mxu1 }
 0x21c   : > { %v1415_v60 = vadd.f32 %v1338_v59, %v1050_v14  ;;  %v5878_v61 = vpop.f32.mrf.mxu0 }
 0x21d   : > { %v4595_v62 = vpop.f32.mrf.mxu1 }
 0x21e   : > { %v1418_v54 = vadd.f32 %v4595_v62, %v4571_v21  ;;  %v5880_v63 = vpop.f32.mrf.mxu0 }
 0x21f   : > { %v1341_v0 = vpop.f32.mrf.mxu1 }
 0x220   : > { %v1416_v1 = vadd.f32 %v1341_v0, %v1053_v25 }
 0x221   : > { %v4598_v2 = vpop.f32.mrf.mxu1  ;;  %v5882_v4 = vpop.f32.mrf.mxu0 }
 0x222   : > { %v1421_v3 = vadd.f32 %v4598_v2, %v4574_v28 }
 0x223   : > { %v1354_v7 = vpop.f32.mrf.mxu1  ;;  %v5884_v44 = vpop.f32.mrf.mxu0 }
 0x224   : > { %v1419_v8 = vadd.f32 %v1354_v7, %v1066_v32 }
 0x225   : > { %v4599_v9 = vpop.f32.mrf.mxu1  ;;  %v4703_v11 = vpop.f32.mrf.mxu0 }
 0x226   : > { %v1422_v10 = vadd.f32 %v4599_v9, %v4575_v35 }
 0x227   : > { %v1357_v12 = vpop.f32.mrf.mxu1  ;;  %v5886_v6 = vpop.f32.mrf.mxu0 }
 0x228   : > { %v1420_v13 = vadd.f32 %v1357_v12, %v1069_v5 }
 0x229   : > { %v4602_v14 = vpop.f32.mrf.mxu1  ;;  %v5888_v19 = vpop.f32.mrf.mxu0 }
 0x22a   : > { %v1425_v16 = vadd.f32 %v4602_v14, %v4578_v38  ;;  %6407 = vst [vmem:[#allocation7_spill] sm:$0xff] %v5888_v19 }
 0x22b   : > { %v1370_v15 = vpop.f32.mrf.mxu1  ;;  %v5890_v22 = vpop.f32.mrf.mxu0 }
 0x22c   : > { %v1423_v21 = vadd.f32 %v1370_v15, %v1082_v39  ;;  %6408 = vst [vmem:[#allocation8_spill] sm:$0xff] %v5890_v22 }
 0x22d   : > { %v4603_v23 = vpop.f32.mrf.mxu1  ;;  %v5892_v25 = vpop.f32.mrf.mxu0 }
 0x22e   : > { %v1426_v24 = vadd.f32 %v4603_v23, %v4579_v43  ;;  %6409 = vst [vmem:[#allocation9_spill] sm:$0xff] %v5892_v25 }
 0x22f   : > { %v1373_v27 = vpop.f32.mrf.mxu1  ;;  %v5894_v30 = vpop.f32.mrf.mxu0 }
 0x230   : > { %v1424_v28 = vadd.f32 %v1373_v27, %v1085_v45  ;;  %6410 = vst [vmem:[#allocation10_spill] sm:$0xff] %v5894_v30 }
 0x231   : > { %v4606_v31 = vpop.f32.mrf.mxu1  ;;  %v5896_v35 = vpop.f32.mrf.mxu0 }
 0x232   : > { %v1429_v32 = vadd.f32 %v4606_v31, %v4582_v48  ;;  %6411 = vst [vmem:[#allocation11_spill] sm:$0xff] %v5896_v35 }
 0x233   : > { %v1386_v5 = vpop.f32.mrf.mxu1  ;;  %v5898_v52 = vpop.f32.mrf.mxu0 }
 0x234   : > { %v1427_v38 = vadd.f32 %v1386_v5, %v1098_v51  ;;  %6412 = vst [vmem:[#allocation12_spill] sm:$0xff] %v5898_v52 }
 0x235   : > { %v4607_v56 = vpop.f32.mrf.mxu1  ;;  %v5900_v39 = vpop.f32.mrf.mxu0 }
 0x237   : > { %v1389_v59 = vpop.f32.mrf.mxu1  ;;  %v5902_v43 = vpop.f32.mrf.mxu0 }
 0x238   : > { %v1428_v62 = vadd.f32 %v1389_v59, %v1101_v53  ;;  %6413 = vst [vmem:[#allocation13_spill] sm:$0xff] %v5902_v43 }
 0x239   : > { %v4618_v0 = vpop.f32.mrf.mxu1  ;;  %v5904_v45 = vpop.f32.mrf.mxu0 }
 0x23a   : > { %v1687_v2 = vadd.f32 %v4618_v0, %v1417_v57 }
 0x23b   : > { %v1608_v7 = vpop.f32.mrf.mxu1  ;;  %v5906_v48 = vpop.f32.mrf.mxu0 }
 0x23c   : > { %v1685_v9 = vadd.f32 %v1608_v7, %v1415_v60 }
 0x23d   : > { %v4619_v11 = vpop.f32.mrf.mxu1  ;;  %v5910_v51 = vpop.f32.mrf.mxu0 }
 0x23e   : > { %v5908_v12 = vadd.f32 %v4619_v11, %v1418_v54  ;;  %v6403_v54 = vmov 0.0  }
 0x23f   : > { %v1611_v14 = vpop.f32.mrf.mxu1  ;;  %v5914_v23 = vpop.f32.mrf.mxu0  ;;  %4776 = vmatprep.subr.mxu0 %v6403_v54  ;;  %4809 = vmatprep.subr.mxu1 %v6403_v54 }
 0x240   : > { %v5912_v15 = vadd.f32 %v1611_v14, %v1416_v1 }
 0x241   : > { %v4622_v53 = vpop.f32.mrf.mxu1  ;;  %v5918_v57 = vpop.f32.mrf.mxu0 }
 0x242   : > { %v5916_v27 = vadd.f32 %v4622_v53, %v1421_v3 }
 0x243   : > { %v1624_v31 = vpop.f32.mrf.mxu1  ;;  %v5922_v60 = vpop.f32.mrf.mxu0 }
 0x244   : > { %v5920_v5 = vadd.f32 %v1624_v31, %v1419_v8 }
 0x245   : > { %v4623_v56 = vpop.f32.mrf.mxu1  ;;  %v4751_v59 = vpop.f32.mrf.mxu0 }
 0x246   : > { %v5926_v1 = vadd.f32 %v4623_v56, %v1422_v10 }
 0x247   : > { %v1627_v0 = vpop.f32.mrf.mxu1 }
 0x248   : > { %v5928_v7 = vadd.f32 %v1627_v0, %v1420_v13 }
 0x249   : > { %v4626_v3 = vpop.f32.mrf.mxu1 }
 0x24a   : > { %v1695_v11 = vadd.f32 %v4626_v3, %v1425_v16 }
 0x24b   : > { %v1640_v14 = vpop.f32.mrf.mxu1 }
 0x24c   : > { %v1693_v53 = vadd.f32 %v1640_v14, %v1423_v21  ;;  %v1936_v14 = vadd.f32 %v5839_v20, %v1685_v9  ;;  %v4233_v20 = vld [vmem:[%s6400_s6 + $0xe0] sm:$0xff] }
 0x24d   : > { %v4627_v8 = vpop.f32.mrf.mxu1 }
 0x24e   : > { %v1696_v31 = vadd.f32 %v4627_v8, %v1426_v24  ;;  %v1939_v8 = vadd.f32 %v5841_v17, %v5908_v12  ;;  %v4232_v17 = vld [vmem:[%s6400_s6 + $0xd8] sm:$0xff] }
 0x24f   : > { %v1643_v22 = vpop.f32.mrf.mxu1 }
 0x250   : > { %v1694_v30 = vadd.f32 %v1643_v22, %v1424_v28 }
 0x251   : > { %v4630_v19 = vpop.f32.mrf.mxu1 }
 0x252   : > { %v1699_v25 = vadd.f32 %v4630_v19, %v1429_v32 }
 0x253   : > { %v1656_v52 = vpop.f32.mrf.mxu1 }
 0x254   : > { %v1697_v43 = vadd.f32 %v1656_v52, %v1427_v38  ;;  %v6414_v38 = vmov 0.0  }
 0x255   : > { %v4631_v35 = vpop.f32.mrf.mxu1  ;;  %4806 = vmatprep.mubr.msk.f32.mxu0 %vm5260_vm4, %v6414_v38  ;;  %4841 = vmatprep.mubr.msk.f32.mxu1 %vm5260_vm4, %v6414_v38 }
 0x257   : > { %v1659_v54 = vpop.f32.mrf.mxu1 }
 0x258   : > { %v1698_v10 = vadd.f32 %v1659_v54, %v1428_v62  ;;  %v4235_v54 = vld [vmem:[%s6400_s6 + $0xf0] sm:$0xff] }
 0x259   : > { %v4650_v56 = vpop.f32.mrf.mxu1 }
 0x25a   : > { %v5930_v59 = vadd.f32 %v4650_v56, %v1695_v11 }
 0x25b   : > { %v1891_v13 = vpop.f32.mrf.mxu1 }
 0x25c   : > { %v5932_v0 = vadd.f32 %v1891_v13, %v1693_v53  ;;  %v1942_v13 = vadd.f32 %v5849_v33, %v5916_v27  ;;  %v4230_v33 = vld [vmem:[%s6400_s6 + $0xc8] sm:$0xff] }
 0x25d   : > { %v4651_v16 = vpop.f32.mrf.mxu1 }
 0x25e   : > { %v5934_v3 = vadd.f32 %v4651_v16, %v1696_v31 }
 0x25f   : > { %v1894_v21 = vpop.f32.mrf.mxu1 }
 0x260   : > { %v5936_v24 = vadd.f32 %v1894_v21, %v1694_v30  ;;  %v4236_v30 = vld [vmem:[%s6400_s6 + $0xf8] sm:$0xff]  ;;  %v1940_v21 = vadd.f32 %v5851_v36, %v5920_v5  ;;  %v4229_v36 = vld [vmem:[%s6400_s6 + $0xc0] sm:$0xff] }
 0x261   : > { %v4654_v22 = vpop.f32.mrf.mxu1  ;;  %4810 = vmatpush3.msra.mxu1 %v4236_v30 }
 0x262   : > { %v5938_v28 = vadd.f32 %v4654_v22, %v1699_v25  ;;  %v1938_v25 = vadd.f32 %v5833_v18, %v1687_v2  ;;  %4811 = vmatprep.subr.mxu1 %v6414_v38  ;;  %v4234_v18 = vld [vmem:[%s6400_s6 + $0xe8] sm:$0xff] }
 0x263   : > { %v1907_v19 = vpop.f32.mrf.mxu1  ;;  %4812 = vmatpush3.msra.mxu1 %v4235_v54  ;;  %v4226_v54 = vld [vmem:[%s6400_s6 + $0xa8] sm:$0xff] }
 0x264   : > { %v5940_v32 = vadd.f32 %v1907_v19, %v1697_v43  ;;  %4813 = vmatprep.subr.mxu1 %v6414_v38  ;;  %v1943_v19 = vadd.f32 %v5854_v37, %v5926_v1  ;;  %v4228_v37 = vld [vmem:[%s6400_s6 + $0xb8] sm:$0xff] }
 0x265   : > { %v4655_v35 = vpop.f32.mrf.mxu1  ;;  %4814 = vmatpush3.msra.mxu1 %v4234_v18 }
 0x266   : > { %4815 = vmatprep.subr.mxu1 %v6414_v38 }
 0x267   : > { %v1910_v52 = vpop.f32.mrf.mxu1  ;;  %4816 = vmatpush3.msra.mxu1 %v4233_v20 }
 0x268   : > { %v5949_v62 = vadd.f32 %v1910_v52, %v1698_v10  ;;  %v1937_v10 = vadd.f32 %v5847_v34, %v5912_v15  ;;  %4817 = vmatprep.subr.mxu1 %v6414_v38  ;;  %v4231_v34 = vld [vmem:[%s6400_s6 + $0xd0] sm:$0xff]  ;;  %v1941_v52 = vadd.f32 %v5856_v29, %v5928_v7 }
 0x269   : > { %v4666_v43 = vpop.f32.mrf.mxu1  ;;  %4818 = vmatpush3.msra.mxu1 %v4232_v17 }
 0x26a   : > { %v5956_v11 = vadd.f32 %v4666_v43, %v1938_v25  ;;  %4819 = vmatprep.subr.mxu1 %v6414_v38  ;;  %v4227_v43 = vld [vmem:[%s6400_s6 + $0xb0] sm:$0xff] }
 0x26b   : > { %v2176_v53 = vpop.f32.mrf.mxu1  ;;  %4820 = vmatpush3.msra.mxu1 %v4231_v34 }
 0x26c   : > { %v5963_v2 = vadd.f32 %v2176_v53, %v1936_v14  ;;  %4821 = vmatprep.subr.mxu1 %v6414_v38 }
 0x26d   : > { %v4667_v31 = vpop.f32.mrf.mxu1  ;;  %4822 = vmatpush3.msra.mxu1 %v4230_v33 }
 0x26e   : > { %v5971_v9 = vadd.f32 %v4667_v31, %v1939_v8  ;;  %4823 = vmatprep.subr.mxu1 %v6414_v38  ;;  %v2522_v34 = vadd.f32 %v5860_v41, %v5963_v2 }
 0x26f   : > { %v2179_v56 = vpop.f32.mrf.mxu1  ;;  %4824 = vmatpush3.msra.mxu1 %v4229_v36 }
 0x270   : > { %v5979_v12 = vadd.f32 %v2179_v56, %v1937_v10  ;;  %4825 = vmatprep.subr.mxu1 %v6414_v38  ;;  %v2525_v33 = vadd.f32 %v5862_v42, %v5971_v9 }
 0x271   : > { %v4670_v16 = vpop.f32.mrf.mxu1  ;;  %4826 = vmatpush3.msra.mxu1 %v4228_v37 }
 0x272   : > { %v2259_v15 = vadd.f32 %v4670_v16, %v1942_v13  ;;  %4827 = vmatprep.subr.mxu1 %v6414_v38  ;;  %v2524_v13 = vadd.f32 %v5858_v26, %v5956_v11  ;;  %v2523_v36 = vadd.f32 %v5864_v46, %v5979_v12 }
 0x273   : > { %v2192_v22 = vpop.f32.mrf.mxu1  ;;  %4828 = vmatpush3.msra.mxu1 %v4227_v43 }
 0x274   : > { %v2257_v27 = vadd.f32 %v2192_v22, %v1940_v21  ;;  %4829 = vmatprep.subr.mxu1 %v6414_v38  ;;  %v2528_v11 = vadd.f32 %v5866_v47, %v2259_v15 }
 0x275   : > { %v4671_v35 = vpop.f32.mrf.mxu1  ;;  %4830 = vmatpush3.msra.mxu1 %v4226_v54 }
 0x276   : > { %v5999_v5 = vadd.f32 %v4671_v35, %v1943_v19  ;;  %4831 = vmatprep.subr.mxu1 %v6414_v38  ;;  %v2526_v41 = vadd.f32 %v5868_v40, %v2257_v27 }
 0x277   : > { %v2195_v30 = vpop.f32.mrf.mxu1 }
 0x278   : > { %v6007_v1 = vadd.f32 %v2195_v30, %v1941_v52 }
 0x279   : > { %v4674_v25 = vpop.f32.mrf.mxu1 }
 0x27a   : > { %v6014_v29 = vadd.f32 %v4674_v25, %v5930_v59  ;;  %v4225_v59 = vld [vmem:[%s6400_s6 + $0xa0] sm:$0xff] }
 0x27b   : > { %v2208_v7 = vpop.f32.mrf.mxu1  ;;  %4832 = vmatpush3.msra.mxu1 %v4225_v59 }
 0x27c   : > { %v6021_v14 = vadd.f32 %v2208_v7, %v5932_v0  ;;  %4833 = vmatprep.subr.mxu1 %v6414_v38  ;;  %v4224_v0 = vld [vmem:[%s6400_s6 + $0x98] sm:$0xff] }
 0x27d   : > { %v4675_v53 = vpop.f32.mrf.mxu1  ;;  %4834 = vmatpush3.msra.mxu1 %v4224_v0 }
 0x27e   : > { %v6028_v18 = vadd.f32 %v4675_v53, %v5934_v3  ;;  %4835 = vmatprep.subr.mxu1 %v6414_v38  ;;  %v4223_v3 = vld [vmem:[%s6400_s6 + $0x90] sm:$0xff] }
 0x27f   : > { %v2211_v8 = vpop.f32.mrf.mxu1  ;;  %4836 = vmatpush3.msra.mxu1 %v4223_v3 }
 0x280   : > { %v6035_v31 = vadd.f32 %v2211_v8, %v5936_v24  ;;  %4837 = vmatprep.subr.mxu1 %v6414_v38 }
 0x281   : > { %v4678_v20 = vpop.f32.mrf.mxu1 }
 0x283   : > { %v2224_v10 = vpop.f32.mrf.mxu1 }
 0x285   : > { %v4679_v56 = vpop.f32.mrf.mxu1 }
 0x287   : > { %v2227_v17 = vpop.f32.mrf.mxu1 }
 0x289   : > { %v4714_v16 = vpop.f32.mrf.mxu1 }
 0x28a   : > { %v6044_v24 = vadd.f32 %v4714_v16, %v2524_v13  ;;  %v2267_v13 = vadd.f32 %v4678_v20, %v5938_v28 }
 0x28b   : > { %v2696_v21 = vpop.f32.mrf.mxu1 }
 0x28c   : > { %v6048_v22 = vadd.f32 %v2696_v21, %v2522_v34  ;;  %v2536_v21 = vadd.f32 %v5882_v4, %v2267_v13  ;;  %v2533_v4 = vadd.f32 %v5878_v61, %v6028_v18  ;;  %v2530_v61 = vadd.f32 %v5876_v58, %v6021_v14 }
 0x28d   : > { %v4715_v19 = vpop.f32.mrf.mxu1 }
 0x28e   : > { %v6052_v35 = vadd.f32 %v4715_v19, %v2525_v33  ;;  %v2266_v19 = vadd.f32 %v2227_v17, %v5949_v62  ;;  %v3064_v62 = vpop.f32.mrf.mxu0 }
 0x28f   : > { %v2699_v52 = vpop.f32.mrf.mxu1 }
 0x290   : > { %v6056_v26 = vadd.f32 %v2699_v52, %v2523_v36 }
 0x291   : > { %v4718_v30 = vpop.f32.mrf.mxu1 }
 0x292   : > { %v6059_v37 = vadd.f32 %v4718_v30, %v2528_v11  ;;  %v2265_v11 = vadd.f32 %v2224_v10, %v5940_v32 }
 0x293   : > { %v2712_v2 = vpop.f32.mrf.mxu1 }
 0x294   : > { %v6062_v25 = vadd.f32 %v2712_v2, %v2526_v41  ;;  %v2535_v41 = vadd.f32 %v5886_v6, %v2266_v19  ;;  %v2534_v28 = vadd.f32 %v5884_v44, %v2265_v11  ;;  %v2532_v6 = vadd.f32 %v5874_v55, %v6014_v29  ;;  %v3499_v11 = vld [vmem:[%s6400_s6 + $0x68] sm:$0xff] }
 0x295   : > { %v4719_v42 = vpop.f32.mrf.mxu1  ;;  %v2531_v44 = vadd.f32 %v5880_v63, %v6035_v31  ;;  %v2529_v55 = vadd.f32 %v5870_v49, %v5999_v5 }
 0x297   : > { %v6064_v9 = vpop.f32.mrf.mxu1 }
 0x299   : > { %v4722_v43 = vpop.f32.mrf.mxu1 }
 0x29b   : > { %v2728_v7 = vpop.f32.mrf.mxu1 }
 0x29c   : > { %v2781_v29 = vadd.f32 %v2728_v7, %v2530_v61  ;;  %v4268_v61 = vld [vmem:[%s6400_s6 + $0x1f8] sm:$0xff] }
 0x29d   : > { %v4723_v54 = vpop.f32.mrf.mxu1 }
 0x29e   : > { %v2784_v32 = vadd.f32 %v4723_v54, %v2533_v4  ;;  %v3098_v14 = vadd.f32 %v5906_v48, %v2781_v29  ;;  %v6418_v48 = vld [vmem:[#allocation13_spill] sm:$0xff]  ;;  %v3492_v4 = vld [vmem:[%s6400_s6 + $0x30] sm:$0xff] }
 0x29f   : > { %v2731_v46 = vpop.f32.mrf.mxu1  ;;  %v4251_v29 = vld [vmem:[%s6400_s6 + $0x170] sm:$0xff] }
 0x2a0   : > { %v2782_v18 = vadd.f32 %v2731_v46, %v2531_v44  ;;  %v4219_v44 = vld [vmem:[%s6398_s4] ss:$0 sm:$0xff] }
 0x2a1   : > { %v4726_v12 = vpop.f32.mrf.mxu1 }
 0x2a2   : > { %v2787_v36 = vadd.f32 %v4726_v12, %v2536_v21  ;;  %v2783_v12 = vadd.f32 %v4722_v43, %v2532_v6  ;;  %v3099_v58 = vadd.f32 %v5914_v23, %v2782_v18  ;;  %v6417_v23 = vld [vmem:[#allocation11_spill] sm:$0xff] }
 0x2a3   : > { %v2744_v53 = vpop.f32.mrf.mxu1  ;;  %v3096_v7 = vadd.f32 %v6417_v23, %v6059_v37  ;;  %v6420_v37 = vld [vmem:[#allocation9_spill] sm:$0xff]  ;;  %v3488_v6 = vld [vmem:[%s6400_s6 + $0x10] sm:$0xff] }
 0x2a4   : > { %v3104_v2 = vadd.f32 %v5918_v57, %v2787_v36  ;;  %v2785_v13 = vadd.f32 %v2744_v53, %v2534_v28  ;;  %v3101_v53 = vadd.f32 %v5910_v51, %v2784_v32  ;;  %v3100_v43 = vadd.f32 %v5904_v45, %v2783_v12  ;;  %v3494_v28 = vld [vmem:[%s6400_s6 + $0x40] sm:$0xff]  ;;  %v3487_v32 = vld [vmem:[%s6400_s6 + $0x8] sm:$0xff] }
 0x2a5   : > { %v4727_v59 = vpop.f32.mrf.mxu1  ;;  %v2527_v51 = vadd.f32 %v5872_v50, %v6007_v1  ;;  %v4221_v12 = vld [vmem:[%s6400_s6 + $0x80] sm:$0xff] }
 0x2a6   : > { %v4245_v23 = vld [vmem:[%s6400_s6 + $0x140] sm:$0xff] }
 0x2a7   : > { %v2747_v8 = vpop.f32.mrf.mxu1  ;;  %v2778_v45 = vadd.f32 %v6064_v9, %v2527_v51  ;;  %v4248_v51 = vld [vmem:[%s6400_s6 + $0x158] sm:$0xff] }
 0x2a8   : > { %v2786_v20 = vadd.f32 %v2747_v8, %v2535_v41  ;;  %v3102_v8 = vadd.f32 %v5922_v60, %v2785_v13  ;;  %v2780_v60 = vadd.f32 %v4719_v42, %v2529_v55  ;;  %v3497_v41 = vld [vmem:[%s6400_s6 + $0x58] sm:$0xff]  ;;  %v3491_v13 = vld [vmem:[%s6400_s6 + $0x28] sm:$0xff]  ;;  %v4267_v55 = vld [vmem:[%s6400_s6 + $0x1f0] sm:$0xff] }
 0x2a9   : > { %v6066_v47 = vpop.f32.mrf.mxu1  ;;  %v3095_v1 = vadd.f32 %v6418_v48, %v2778_v45  ;;  %v4262_v45 = vld [vmem:[%s6400_s6 + $0x1c8] sm:$0xff]  ;;  %v4243_v48 = vld [vmem:[%s6400_s6 + $0x130] sm:$0xff] }
 0x2aa   : > { %v3103_v57 = vadd.f32 %v3064_v62, %v2786_v20  ;;  %v3097_v5 = vadd.f32 %v5900_v39, %v2780_v60  ;;  %v6419_v39 = vld [vmem:[#allocation12_spill] sm:$0xff] }
 0x2ab   : > { %v6068_v15 = vpop.f32.mrf.mxu1  ;;  %v3094_v9 = vadd.f32 %v6419_v39, %v6062_v25  ;;  %v3493_v20 = vld [vmem:[%s6400_s6 + $0x38] sm:$0xff]  ;;  %v3490_v62 = vld [vmem:[%s6400_s6 + $0x20] sm:$0xff]  ;;  %v4242_v39 = vld [vmem:[%s6400_s6 + $0x128] sm:$0xff] }
 0x2ac   : > { %6415 = vst [vmem:[#allocation14_spill] sm:$0xff] %v6068_v15  ;;  %v4265_v60 = vld [vmem:[%s6400_s6 + $0x1e0] sm:$0xff] }
 0x2ad   : > { %v6070_v0 = vpop.f32.mrf.mxu1 }
 0x2af   : > { %v6072_v40 = vpop.f32.mrf.mxu1 }
 0x2b0   : > { %6416 = vst [vmem:[#allocation15_spill] sm:$0xff] %v6072_v40 }
 0x2b1   : > { %v6074_v27 = vpop.f32.mrf.mxu1 }
 0x2b2   : > { %v3365_v50 = vadd.f32 %v6074_v27, %v3096_v7  ;;  %v6421_v27 = vld [vmem:[#allocation7_spill] sm:$0xff] }
 0x2b3   : > { %v6076_v3 = vpop.f32.mrf.mxu1  ;;  %v4260_v7 = vld [vmem:[%s6400_s6 + $0x1b8] sm:$0xff] }
 0x2b5   : > { %v4767_v56 = vpop.f32.mrf.mxu1 }
 0x2b6   : > { %v3366_v54 = vadd.f32 %v4767_v56, %v3097_v5  ;;  %v3363_v56 = vadd.f32 %v6076_v3, %v3094_v9  ;;  %v4246_v5 = vld [vmem:[%s6400_s6 + $0x148] sm:$0xff]  ;;  %v4257_v9 = vld [vmem:[%s6400_s6 + $0x1a0] sm:$0xff] }
 0x2b7   : > { %v6079_v16 = vpop.f32.mrf.mxu1  ;;  %v6424_v36 = vld [vmem:[#allocation15_spill] sm:$0xff] }
 0x2b8   : > { %v3364_v46 = vadd.f32 %v6079_v16, %v3095_v1  ;;  %v6422_v16 = vld [vmem:[#allocation10_spill] sm:$0xff] }
 0x2b9   : > { %v4770_v34 = vpop.f32.mrf.mxu1  ;;  %v3091_v19 = vadd.f32 %v6422_v16, %v6056_v26  ;;  %v3501_v26 = vld [vmem:[%s6400_s6 + $0x78] sm:$0xff]  ;;  %v4258_v1 = vld [vmem:[%s6400_s6 + $0x1a8] sm:$0xff] }
 0x2ba   : > { %v3369_v31 = vadd.f32 %v4770_v34, %v3100_v43  ;;  %v3092_v34 = vadd.f32 %v6421_v27, %v6044_v24  ;;  %v6425_v24 = vld [vmem:[#allocation14_spill] sm:$0xff] }
 0x2bb   : > { %v3314_v33 = vpop.f32.mrf.mxu1  ;;  %v4266_v43 = vld [vmem:[%s6400_s6 + $0x1e8] sm:$0xff]  ;;  %v4239_v27 = vld [vmem:[%s6400_s6 + $0x110] sm:$0xff] }
 0x2bc   : > { %v3367_v42 = vadd.f32 %v3314_v33, %v3098_v14  ;;  %v3361_v25 = vadd.f32 %v6066_v47, %v3092_v34  ;;  %v3389_v47 = vld [vmem:[%s6399_s5] sm:$0xf]  ;;  %v4263_v14 = vld [vmem:[%s6400_s6 + $0x1d0] sm:$0xff]  ;;  %v4254_v34 = vld [vmem:[%s6400_s6 + $0x188] sm:$0xff] }
 0x2bd   : > { %v4771_v52 = vpop.f32.mrf.mxu1 }
 0x2be   : > { %v3370_v63 = vadd.f32 %v4771_v52, %v3101_v53  ;;  %v3360_v52 = vadd.f32 %v6424_v36, %v3091_v19  ;;  %v4237_v19 = vld [vmem:[%s6400_s6 + $0x100] sm:$0xff] }
 0x2bf   : > { %v3317_v30 = vpop.f32.mrf.mxu1 }
 0x2c0   : > { %v3368_v49 = vadd.f32 %v3317_v30, %v3099_v58  ;;  %v3498_v30 = vld [vmem:[%s6400_s6 + $0x60] sm:$0xff]  ;;  %v4264_v58 = vld [vmem:[%s6400_s6 + $0x1d8] sm:$0xff] }
 0x2c1   : > { %v4774_v59 = vpop.f32.mrf.mxu1 }
 0x2c2   : > { %v3373_v15 = vadd.f32 %v4774_v59, %v3104_v2  ;;  %v3496_v2 = vld [vmem:[%s6400_s6 + $0x50] sm:$0xff]  ;;  %v3495_v59 = vld [vmem:[%s6400_s6 + $0x48] sm:$0xff] }
 0x2c3   : > { %v3330_v40 = vpop.f32.mrf.mxu1 }
 0x2c4   : > { %4777 = vmatpush3.msra.mxu0 %v3373_v15  ;;  %v3371_v15 = vadd.f32 %v3330_v40, %v3102_v8  ;;  %v3093_v40 = vadd.f32 %v6420_v37, %v6052_v35  ;;  %v6423_v35 = vld [vmem:[#allocation8_spill] sm:$0xff] }
 0x2c5   : > { %v4775_v17 = vpop.f32.mrf.mxu1  ;;  %4778 = vmatprep.subr.mxu0 %v6414_v38  ;;  %v3090_v3 = vadd.f32 %v6423_v35, %v6048_v22  ;;  %v3500_v22 = vld [vmem:[%s6400_s6 + $0x70] sm:$0xff]  ;;  %v4256_v37 = vld [vmem:[%s6400_s6 + $0x198] sm:$0xff] }
 0x2c6   : > { %v3362_v33 = vadd.f32 %v6070_v0, %v3093_v40  ;;  %v3489_v17 = vld [vmem:[%s6400_s6 + $0x18] sm:$0xff] }
 0x2c7   : > { %v3333_v10 = vpop.f32.mrf.mxu1  ;;  %v3359_v0 = vadd.f32 %v6425_v24, %v3090_v3  ;;  %v4240_v40 = vld [vmem:[%s6400_s6 + $0x118] sm:$0xff] }
 0x2c8   : > { %v3372_v21 = vadd.f32 %v3333_v10, %v3103_v57  ;;  %v4222_v57 = vld [vmem:[%s6400_s6 + $0x88] sm:$0xff]  ;;  %v3486_v10 = vld [vmem:[%s6400_s6] sm:$0xff] }
 0x2c9   : > { %4838 = vmatpush3.msra.mxu1 %v4222_v57 }
 0x2ca   : > { %4779 = vmatpush3.msra.mxu0 %v3372_v21  ;;  %4839 = vmatprep.subr.mxu1 %v6414_v38 }
 0x2cb   : > { %4780 = vmatprep.subr.mxu0 %v6414_v38  ;;  %4840 = vmatpush3.msra.mxu1 %v4221_v12 }
 0x2cc   : > { %4781 = vmatpush3.msra.mxu0 %v3371_v15  ;;  %4879 = vmatprep.subr.mxu1 %v6414_v38  ;;  %v4252_v15 = vld [vmem:[%s6400_s6 + $0x178] sm:$0xff] }
 0x2cd   : > { %4782 = vmatprep.subr.mxu0 %v6414_v38 }
 0x2ce   : > { %4783 = vmatpush3.msra.mxu0 %v3370_v63  ;;  %v4250_v63 = vld [vmem:[%s6400_s6 + $0x168] sm:$0xff] }
 0x2cf   : > { %4784 = vmatprep.subr.mxu0 %v6414_v38 }
 0x2d0   : > { %4785 = vmatpush3.msra.mxu0 %v3369_v31  ;;  %v4249_v31 = vld [vmem:[%s6400_s6 + $0x160] sm:$0xff] }
 0x2d1   : > { %4786 = vmatprep.subr.mxu0 %v6414_v38 }
 0x2d2   : > { %4787 = vmatpush3.msra.mxu0 %v3368_v49  ;;  %v4247_v49 = vld [vmem:[%s6400_s6 + $0x150] sm:$0xff] }
 0x2d3   : > { %4788 = vmatprep.subr.mxu0 %v6414_v38 }
 0x2d4   : > { %4789 = vmatpush3.msra.mxu0 %v3367_v42  ;;  %v4261_v42 = vld [vmem:[%s6400_s6 + $0x1c0] sm:$0xff] }
 0x2d5   : > { %4790 = vmatprep.subr.mxu0 %v6414_v38 }
 0x2d6   : > { %4791 = vmatpush3.msra.mxu0 %v3366_v54  ;;  %v4244_v54 = vld [vmem:[%s6400_s6 + $0x138] sm:$0xff] }
 0x2d7   : > { %4792 = vmatprep.subr.mxu0 %v6414_v38 }
 0x2d8   : > { %4793 = vmatpush3.msra.mxu0 %v3365_v50  ;;  %v4259_v50 = vld [vmem:[%s6400_s6 + $0x1b0] sm:$0xff] }
 0x2d9   : > { %4794 = vmatprep.subr.mxu0 %v6414_v38 }
 0x2da   : > { %4795 = vmatpush3.msra.mxu0 %v3364_v46  ;;  %v4241_v46 = vld [vmem:[%s6400_s6 + $0x120] sm:$0xff] }
 0x2db   : > { %4796 = vmatprep.subr.mxu0 %v6414_v38 }
 0x2dc   : > { %4797 = vmatpush3.msra.mxu0 %v3363_v56  ;;  %v4255_v56 = vld [vmem:[%s6400_s6 + $0x190] sm:$0xff] }
 0x2dd   : > { %4798 = vmatprep.subr.mxu0 %v6414_v38 }
 0x2de   : > { %4799 = vmatpush3.msra.mxu0 %v3362_v33  ;;  %v4238_v33 = vld [vmem:[%s6400_s6 + $0x108] sm:$0xff] }
 0x2df   : > { %4800 = vmatprep.subr.mxu0 %v6414_v38 }
 0x2e0   : > { %4801 = vmatpush3.msra.mxu0 %v3361_v25  ;;  %v4253_v25 = vld [vmem:[%s6400_s6 + $0x180] sm:$0xff] }
 0x2e1   : > { %4802 = vmatprep.subr.mxu0 %v6414_v38 }
 0x2e2   : > { %4803 = vmatpush3.msra.mxu0 %v3360_v52 }
 0x2e3   : > { %4804 = vmatprep.subr.mxu0 %v6414_v38 }
 0x2e4   : > { %4805 = vmatpush3.msra.mxu0 %v3359_v0 }
 0x2e5   : > { %4807 = vmatmul.mubr.msk.f32.vlgmr.msra.gmra.mxu0 %vm3412_vm5, %v3389_v47  ;;  %4844 = vmatprep.subr.mxu0 %v6414_v38 }
 0x2e6   : > { %4845 = vmatpush3.msra.mxu0 %v3501_v26  ;;  %4876 = vmatprep.mubr.msk.f32.mxu0 %vm5260_vm4, %v6414_v38 }
 0x2e7   : > { %4846 = vmatprep.subr.mxu0 %v6414_v38 }
 0x2e8   : > { %4847 = vmatpush3.msra.mxu0 %v3500_v22 }
 0x2e9   : > { %4848 = vmatprep.subr.mxu0 %v6414_v38 }
 0x2ea   : > { %4849 = vmatpush3.msra.mxu0 %v3499_v11 }
 0x2eb   : > { %4850 = vmatprep.subr.mxu0 %v6414_v38 }
 0x2ec   : > { %4851 = vmatpush3.msra.mxu0 %v3498_v30  ;;  %v3842_v30 = vld [vmem:[%s6401_s7] sm:$0x1] }
 0x2ed   : > { %4852 = vmatprep.subr.mxu0 %v6414_v38 }
 0x2ee   : > { %4853 = vmatpush3.msra.mxu0 %v3497_v41 }
 0x2ef   : > { %4854 = vmatprep.subr.mxu0 %v6414_v38 }
 0x2f0   : > { %4855 = vmatpush3.msra.mxu0 %v3496_v2 }
 0x2f1   : > { %4856 = vmatprep.subr.mxu0 %v6414_v38 }
 0x2f2   : > { %4857 = vmatpush3.msra.mxu0 %v3495_v59 }
 0x2f3   : > { %4858 = vmatprep.subr.mxu0 %v6414_v38 }
 0x2f4   : > { %4859 = vmatpush3.msra.mxu0 %v3494_v28 }
 0x2f5   : > { %4860 = vmatprep.subr.mxu0 %v6414_v38 }
 0x2f6   : > { %4861 = vmatpush3.msra.mxu0 %v3493_v20 }
 0x2f7   : > { %4862 = vmatprep.subr.mxu0 %v6414_v38 }
 0x2f8   : > { %4863 = vmatpush3.msra.mxu0 %v3492_v4 }
 0x2f9   : > { %4864 = vmatprep.subr.mxu0 %v6414_v38 }
 0x2fa   : > { %4865 = vmatpush3.msra.mxu0 %v3491_v13 }
 0x2fb   : > { %4866 = vmatprep.subr.mxu0 %v6414_v38 }
 0x2fc   : > { %4867 = vmatpush3.msra.mxu0 %v3490_v62 }
 0x2fd   : > { %4868 = vmatprep.subr.mxu0 %v6414_v38 }
 0x2fe   : > { %4869 = vmatpush3.msra.mxu0 %v3489_v17 }
 0x2ff   : > { %4870 = vmatprep.subr.mxu0 %v6414_v38 }
 0x300   : > { %4871 = vmatpush3.msra.mxu0 %v3488_v6 }
 0x301   : > { %4872 = vmatprep.subr.mxu0 %v6414_v38 }
 0x302   : > { %4873 = vmatpush3.msra.mxu0 %v3487_v32 }
 0x303   : > { %4874 = vmatprep.subr.mxu0 %v6414_v38 }
 0x304   : > { %4875 = vmatpush3.msra.mxu0 %v3486_v10 }
 0x305   : > { %4914 = vmatprep.subr.mxu0 %v6414_v38 }
 0x3a5   : > { %v3482_v8 = vpop.f32.mrf.mxu0 }
 0x3a6   : > { %v6221_v21 = vadd.f32 %v4219_v44, %v3482_v8 }
 0x3a7   : > { %v4808_v18 = vpop.f32.mrf.mxu0 }
 0x3a8   : > { %v3520_v53 = vrot.slane %v6221_v21, 1  ;;  %4877 = vmatmul.mubr.f32.vlgmr.msra.gmra.mxu0 %v6221_v21  ;;  %v3769_v16 = vrot.slane %v6221_v21, 3  ;;  %v3679_v35 = vrot.slane %v6221_v21, 2 }
 0x3a9   : > { %4915 = vmatpush3.msra.mxu0 %v4268_v61  ;;  %4946 = vmatprep.mubr.msk.f32.mxu0 %vm5260_vm4, %v6414_v38 }
 0x3aa   : > { %4916 = vmatprep.subr.mxu0 %v6414_v38  ;;  %4842 = vmatmul.mubr.f32.vlgmr.msra.gmra.mxu1 %v3520_v53 }
 0x3ab   : > { %4880 = vmatpush3.msra.mxu1 %v4252_v15  ;;  %4917 = vmatpush3.msra.mxu0 %v4267_v55 }
 0x3ac   : > { %4881 = vmatprep.subr.mxu1 %v6414_v38  ;;  %4918 = vmatprep.subr.mxu0 %v6414_v38 }
 0x3ad   : > { %4882 = vmatpush3.msra.mxu1 %v4251_v29  ;;  %4919 = vmatpush3.msra.mxu0 %v4266_v43 }
 0x3ae   : > { %4883 = vmatprep.subr.mxu1 %v6414_v38  ;;  %4920 = vmatprep.subr.mxu0 %v6414_v38 }
 0x3af   : > { %4884 = vmatpush3.msra.mxu1 %v4250_v63  ;;  %4921 = vmatpush3.msra.mxu0 %v4265_v60 }
 0x3b0   : > { %4885 = vmatprep.subr.mxu1 %v6414_v38  ;;  %4922 = vmatprep.subr.mxu0 %v6414_v38 }
 0x3b1   : > { %4886 = vmatpush3.msra.mxu1 %v4249_v31  ;;  %4923 = vmatpush3.msra.mxu0 %v4264_v58 }
 0x3b2   : > { %4887 = vmatprep.subr.mxu1 %v6414_v38  ;;  %4924 = vmatprep.subr.mxu0 %v6414_v38 }
 0x3b3   : > { %4888 = vmatpush3.msra.mxu1 %v4248_v51  ;;  %4925 = vmatpush3.msra.mxu0 %v4263_v14 }
 0x3b4   : > { %4889 = vmatprep.subr.mxu1 %v6414_v38  ;;  %4926 = vmatprep.subr.mxu0 %v6414_v38 }
 0x3b5   : > { %4890 = vmatpush3.msra.mxu1 %v4247_v49  ;;  %4927 = vmatpush3.msra.mxu0 %v4262_v45 }
 0x3b6   : > { %4891 = vmatprep.subr.mxu1 %v6414_v38  ;;  %4928 = vmatprep.subr.mxu0 %v6414_v38 }
 0x3b7   : > { %4892 = vmatpush3.msra.mxu1 %v4246_v5  ;;  %4929 = vmatpush3.msra.mxu0 %v4261_v42 }
 0x3b8   : > { %4893 = vmatprep.subr.mxu1 %v6414_v38  ;;  %4930 = vmatprep.subr.mxu0 %v6414_v38 }
 0x3b9   : > { %4894 = vmatpush3.msra.mxu1 %v4245_v23  ;;  %4931 = vmatpush3.msra.mxu0 %v4260_v7 }
 0x3ba   : > { %4895 = vmatprep.subr.mxu1 %v6414_v38  ;;  %4932 = vmatprep.subr.mxu0 %v6414_v38 }
 0x3bb   : > { %4896 = vmatpush3.msra.mxu1 %v4244_v54  ;;  %4933 = vmatpush3.msra.mxu0 %v4259_v50 }
 0x3bc   : > { %4897 = vmatprep.subr.mxu1 %v6414_v38  ;;  %4934 = vmatprep.subr.mxu0 %v6414_v38 }
 0x3bd   : > { %4898 = vmatpush3.msra.mxu1 %v4243_v48  ;;  %4935 = vmatpush3.msra.mxu0 %v4258_v1 }
 0x3be   : > { %4899 = vmatprep.subr.mxu1 %v6414_v38  ;;  %4936 = vmatprep.subr.mxu0 %v6414_v38 }
 0x3bf   : > { %4900 = vmatpush3.msra.mxu1 %v4242_v39  ;;  %4937 = vmatpush3.msra.mxu0 %v4257_v9 }
 0x3c0   : > { %4901 = vmatprep.subr.mxu1 %v6414_v38  ;;  %4938 = vmatprep.subr.mxu0 %v6414_v38 }
 0x3c1   : > { %4902 = vmatpush3.msra.mxu1 %v4241_v46  ;;  %4939 = vmatpush3.msra.mxu0 %v4256_v37 }
 0x3c2   : > { %4903 = vmatprep.subr.mxu1 %v6414_v38  ;;  %4940 = vmatprep.subr.mxu0 %v6414_v38 }
 0x3c3   : > { %4904 = vmatpush3.msra.mxu1 %v4240_v40  ;;  %4941 = vmatpush3.msra.mxu0 %v4255_v56 }
 0x3c4   : > { %4905 = vmatprep.subr.mxu1 %v6414_v38  ;;  %4942 = vmatprep.subr.mxu0 %v6414_v38 }
 0x3c5   : > { %4906 = vmatpush3.msra.mxu1 %v4239_v27  ;;  %4943 = vmatpush3.msra.mxu0 %v4254_v34 }
 0x3c6   : > { %4907 = vmatprep.subr.mxu1 %v6414_v38  ;;  %4944 = vmatprep.subr.mxu0 %v6414_v38 }
 0x3c7   : > { %4908 = vmatpush3.msra.mxu1 %v4238_v33  ;;  %4945 = vmatpush3.msra.mxu0 %v4253_v25 }
 0x3c8   : > { %4909 = vmatprep.subr.mxu1 %v6414_v38  ;;  %4947 = vmatmul.mubr.f32.vlgmr.msra.gmra.mxu0 %v3769_v16 }
 0x3c9   : > { %4910 = vmatpush3.msra.mxu1 %v4237_v19  ;;  %4911 = vmatprep.mubr.msk.f32.mxu1 %vm5260_vm4, %v6414_v38 }
 0x3ca   : > { %4912 = vmatmul.mubr.f32.vlgmr.msra.gmra.mxu1 %v3679_v35 }
 0x468   : > { %v3658_v3 = vpop.f32.mrf.mxu0 }
 0x46a   : > { %v3588_v36 = vpop.f32.mrf.mxu1  ;;  %v4878_v52 = vpop.f32.mrf.mxu0 }
 0x46b   : > { %v3659_v47 = vadd.f32 %v3658_v3, %v3588_v36 }
 0x46c   : > { %v4843_v24 = vpop.f32.mrf.mxu1 }
 0x488   : > { %v3837_v0 = vpop.f32.mrf.mxu0 }
 0x48a   : > { %v3747_v26 = vpop.f32.mrf.mxu1  ;;  %v4948_v22 = vpop.f32.mrf.mxu0 }
 0x48b   : > { %v3751_v11 = vadd.f32 %v3747_v26, %v3659_v47 }
 0x48c   : > { %v4913_v41 = vpop.f32.mrf.mxu1 }
 0x48d   : > { %v3841_v38 = vadd.f32 %v3837_v0, %v3751_v11 }
 0x48f   : > { %v3843_v2 = vadd.f32 %v3842_v30, %v3841_v38 }
 0x491   : > { %3845 = vst.msk [vmem:[%s297_s24] sm:$0x1] %vm3844_vm6, %v3843_v2 }
 0x492   : > { %5210 = shalt.err (!%p5207_p3)
}
 0x493   : > { %s5211_s22 = scalar_lea.hbm %s3857_s10, 16  ;;  %s5215_s26 = scalar_lea.hbm %s6402_s8, 32 }
 0x494   : > { %p5212_p4 = scmp.ne.s32.totalorder %s3857_s10, %s5211_s22  ;;  %p5216_p9 = scmp.lt.s32.totalorder %s3857_s10, %s6402_s8 }
 0x495   : > { %p5217_p10 = scmp.lt.s32.totalorder %s5215_s26, %s5211_s22 }
 0x496   : > { %p5213_p7 = pnand %p5212_p4, %p5345_p5 }
 0x497   : > { %p5218_p11 = por %p5217_p10, %p5216_p9 }
 0x498   : > { %p5214_p8 = pneg %p5213_p7 }
 0x49a   : > { %p5219_p12 = pnand %p5218_p11, %p5214_p8 }
 0x49c   : > { %5222 = shalt.err (!%p5219_p12)
}
 0x49d   : > { %4958 = dma.vmem_to_hbm [thread:$0]  (%p5345_p5), %s3860_s25, 16, %s3857_s10, %s3847_s17  }
 0x49e PF: > { %p4964_p13 = scmp.ge.s32.totalorder %s5257_s30, 2  ;;  %s3871_s13 = sand.u32 1, %s5245_s27  }
 0x49f   : > { %s3872_s18 = scalar_lea.sflag [#allocation5], %s3871_s13 }
 0x4a0   : > { %p4961_p0 = pnand %p4964_p13, %p5349_p6 }
 0x4a2   : > { %p4962_p1 = pneg %p4961_p0 }
 0x4a4   : > { %5240 = dma.done.wait (%p4962_p1), %s3872_s18, 16  }
 0x4a5   : > { %5242 = vsyncadd (%p4962_p1), %s3872_s18, 4294967280  ;;  %p18_p2 = scmp.ge.s32.totalorder %s5332_s11, 4   ;;  %s6426_s27 = smov %s5249_s28 }
 0x4a6   : > { %s6427_s28 = smov %s5253_s29  ;;  %s6428_s29 = smov %s5343_s14 }
 0x4a7   : > { %s6429_s30 = smov %s5332_s11  ;;  %20 = sbr.rel (!%p18_p2) target bundleno = 3 (0x3), region = 98 }
 0x4ac   :  { %3876 = vsyncpa [#allocation5], 1 }
 0x4ad   :  { %3878 = vsyncpa [#allocation5 + $0x1], 1 }

</bundles_post_ra>
